<compile_context>
chip_gen: v6e
topology: v6e:2x2x1
jax: 0.10.0
libtpu: 0.0.40
codegen_flags: <defaults>
</compile_context>

<pallas_src>
import functools

import jax
import jax.numpy as jnp
from jax.experimental import pallas as pl
from jax.experimental.pallas import tpu as pltpu

_LANE = 128
_SUBLANE = 8
_VMEM_BUDGET = 48 << 20  # conservative cap; fits v7x's 64 MiB with headroom


def _round_up(n, m):
    return ((n + m - 1) // m) * m


def _feature_pad(d):
    # 128-lane minimum for lane-dense stores/matmuls; once the real feature dim
    # exceeds 128, pad to a 256 multiple so v6e/v7x 256x256 MXUs run full width.
    return _round_up(d, _LANE) if d <= _LANE else _round_up(d, 2 * _LANE)


# ---------------------------------------------------------------------------
# Trace-time capability probe for single-buffered (grid-invariant) BlockSpecs.
# ---------------------------------------------------------------------------
_BUFFERED_OK = None


def _buffered_supported():
    global _BUFFERED_OK
    if _BUFFERED_OK is None:
        try:
            def _probe_kernel(a_ref, o_ref):
                o_ref[...] = a_ref[...]

            fn = pl.pallas_call(
                _probe_kernel,
                out_shape=jax.ShapeDtypeStruct((_SUBLANE, _LANE), jnp.float32),
                grid=(1,),
                in_specs=[pl.BlockSpec((_SUBLANE, _LANE), lambda i: (0, 0),
                                       pipeline_mode=pl.Buffered(1))],
                out_specs=pl.BlockSpec((_SUBLANE, _LANE), lambda i: (0, 0)),
            )
            # Lowering only -- no execution, no silent re-run of real work.
            jax.jit(fn).lower(jnp.zeros((_SUBLANE, _LANE), jnp.float32))
            _BUFFERED_OK = True
        except Exception:
            _BUFFERED_OK = False
    return _BUFFERED_OK


# ---------------------------------------------------------------------------
# Kernel
# ---------------------------------------------------------------------------
def _make_mlp_kernel(n_hidden):
    """Fused (linear -> gauss-act) * n_hidden -> linear kernel body."""

    def kernel(x_ref, *refs):
        # refs: [w_0, b_0, c_0, ..., w_{n-1}, b_{n-1}, c_{n-1}, w_out, b_out, out]
        h = x_ref[...].astype(jnp.float32)
        idx = 0
        for _ in range(n_hidden):
            w = refs[idx][...]        # [in_p, hidden_p]   (matmul dtype)
            b = refs[idx + 1][...]    # [1, hidden_p]      (f32)
            c = refs[idx + 2][...]    # [1, hidden_p]      (f32), c = -0.5/(a+s)^2
            idx += 3
            h = jnp.dot(h.astype(w.dtype), w,
                        preferred_element_type=jnp.float32) + b
            h = jnp.exp(h * h * c)    # Gaussian activation (coefficient precomputed)
        w_out = refs[idx][...]        # [hidden_p, out_p]
        b_out = refs[idx + 1][...]    # [1, out_p]
        out_ref = refs[idx + 2]
        out_ref[...] = (jnp.dot(h.astype(w_out.dtype), w_out,
                                preferred_element_type=jnp.float32)
                        + b_out).astype(out_ref.dtype)

    return kernel


# ---------------------------------------------------------------------------
# One-time parameter preparation (padding, casting, coefficient computation)
# ---------------------------------------------------------------------------
def _pad_mat(w, rows, cols, dtype):
    w = jnp.asarray(w, jnp.float32)
    r, c = w.shape
    return jnp.pad(w, ((0, rows - r), (0, cols - c))).astype(dtype)


def _pad_vec(v, cols, pad_value=0.0):
    v = jnp.asarray(v, jnp.float32).reshape(1, -1)
    return jnp.pad(v, ((0, 0), (0, cols - v.shape[1])),
                   constant_values=pad_value)


def prepare_operands(params, *, n_hidden, scale, matmul_dtype=jnp.bfloat16):
    """Pads / casts all weights once and folds (a, scale) into an exact-f32
    coefficient c = -0.5 / (a + s)^2.  Returns (operands_tuple, meta)."""
    input_dim = params["w"][0].shape[0]
    hidden_dim = params["w"][0].shape[1]
    output_dim = params["w_out"].shape[1]
    hidden_p = _feature_pad(hidden_dim)
    output_p = _feature_pad(output_dim)

    ops = []
    for i in range(n_hidden):
        in_d = input_dim if i == 0 else hidden_p
        ops.append(_pad_mat(params["w"][i], in_d, hidden_p, matmul_dtype))
        ops.append(_pad_vec(params["b"][i], hidden_p, 0.0))
        s = float(scale) * float(i == 0 or i == n_hidden - 1)
        sig = jnp.asarray(params["a"][i], jnp.float32) + jnp.float32(s)
        c = -0.5 / (sig * sig)                      # exact f32, computed once
        # Padded lanes see h = 0 (bias pad 0) so exp(0*c)=1 regardless of c pad,
        # and the next layer's padded weight rows are zero -> no contribution.
        ops.append(_pad_vec(c, hidden_p, -0.5))
    ops.append(_pad_mat(params["w_out"], hidden_p, output_p, matmul_dtype))
    ops.append(_pad_vec(params["b_out"], output_p, 0.0))

    meta = dict(input_dim=input_dim, hidden_dim=hidden_dim,
                output_dim=output_dim, hidden_p=hidden_p, output_p=output_p)
    return tuple(ops), meta


# ---------------------------------------------------------------------------
# Tile selection
# ---------------------------------------------------------------------------
def _choose_tile_m(M, preferred, weight_bytes, input_dim, hidden_p, output_p):
    if M <= _SUBLANE:
        return _round_up(max(M, 1), _SUBLANE)
    # Keep >= 2 grid steps so both v7x TensorCores get work (v5e/v6e: harmless).
    cap = _round_up(pl.cdiv(M, 2), _SUBLANE)
    tile = min(_round_up(preferred, _SUBLANE), cap)
    # Keep double-buffered x/out tiles + live f32 intermediates + resident
    # weights under the VMEM budget.
    per_row = 4 * (2 * input_dim + 2 * output_p + 2 * hidden_p)
    while tile > _SUBLANE and weight_bytes + tile * per_row > _VMEM_BUDGET:
        tile = _round_up(tile // 2, _SUBLANE)
    return max(tile, _SUBLANE)


# ---------------------------------------------------------------------------
# Jitted forward
# ---------------------------------------------------------------------------
@functools.partial(jax.jit, static_argnames=(
    "n_hidden", "input_dim", "output_dim", "hidden_p", "output_p",
    "preferred_tile_m", "use_buffered"))
def _forward(x, operands, *, n_hidden, input_dim, output_dim, hidden_p,
             output_p, preferred_tile_m, use_buffered):
    M = x.shape[0]
    weight_bytes = sum(int(o.size) * o.dtype.itemsize for o in operands)
    tile_m = _choose_tile_m(M, preferred_tile_m, weight_bytes,
                            input_dim, hidden_p, output_p)
    m_pad = _round_up(M, tile_m)

    x_p = x.astype(jnp.float32)
    if m_pad != M:
        x_p = jnp.pad(x_p, ((0, m_pad - M), (0, 0)))

    grid = (m_pad // tile_m,)

    def _invariant_spec(arr):
        if use_buffered:
            # Grid-invariant operand: one resident VMEM copy is enough.
            return pl.BlockSpec(arr.shape, lambda i: (0, 0),
                                pipeline_mode=pl.Buffered(1))
        return pl.BlockSpec(arr.shape, lambda i: (0, 0))

    in_specs = [pl.BlockSpec((tile_m, input_dim), lambda i: (i, 0))]
    in_specs += [_invariant_spec(o) for o in operands]
    out_spec = pl.BlockSpec((tile_m, output_p), lambda i: (i, 0))

    # Advisory cost estimate for the XLA scheduler.
    flops = 2 * m_pad * (input_dim * hidden_p
                         + (n_hidden - 1) * hidden_p * hidden_p
                         + hidden_p * output_p)
    transcendentals = n_hidden * m_pad * hidden_p
    bytes_accessed = (m_pad * input_dim * 4
                      + m_pad * output_p * x.dtype.itemsize
                      + weight_bytes)
    cost = pl.CostEstimate(flops=flops, transcendentals=transcendentals,
                           bytes_accessed=bytes_accessed)

    # Only raise the scoped VMEM limit when the footprint actually needs it.
    vmem_est = (weight_bytes * (1 if use_buffered else 2)
                + 2 * tile_m * 4 * (input_dim + output_p)
                + 2 * tile_m * 4 * hidden_p)
    cp_kwargs = dict(dimension_semantics=("parallel",))
    if vmem_est > (24 << 20):
        cp_kwargs["vmem_limit_bytes"] = min(int(vmem_est * 1.5), 64 << 20)

    out_padded = pl.pallas_call(
        _make_mlp_kernel(n_hidden),
        out_shape=jax.ShapeDtypeStruct((m_pad, output_p), x.dtype),
        grid_spec=pltpu.PrefetchScalarGridSpec(
            num_scalar_prefetch=0,
            grid=grid,
            in_specs=in_specs,
            out_specs=out_spec,
        ),
        compiler_params=pltpu.CompilerParams(**cp_kwargs),
        cost_estimate=cost,
    )(x_p, *operands)

    # Fused into the jit; drops the padded rows/lanes.
    return out_padded[:M, :output_dim]


def gauss_act_mlp(x, operands, meta, *, n_hidden, preferred_tile_m=1024):
    return _forward(
        x, operands,
        n_hidden=n_hidden,
        input_dim=meta["input_dim"],
        output_dim=meta["output_dim"],
        hidden_p=meta["hidden_p"],
        output_p=meta["output_p"],
        preferred_tile_m=preferred_tile_m,
        use_buffered=_buffered_supported(),
    )


# ---------------------------------------------------------------------------
# Plain-JAX reference and parameter init
# ---------------------------------------------------------------------------
def gauss_act_mlp_ref(x, params, *, n_hidden, scale=0.0,
                      matmul_dtype=jnp.float32):
    """matmul_dtype=float32 reproduces the PyTorch f32 semantics;
    matmul_dtype=bfloat16 mirrors the kernel's MXU operand precision."""
    h = x.astype(jnp.float32)
    for i in range(n_hidden):
        w = params["w"][i].astype(matmul_dtype)
        h = jnp.dot(h.astype(matmul_dtype), w,
                    preferred_element_type=jnp.float32) + params["b"][i]
        s = float(scale) * float(i == 0 or i == n_hidden - 1)
        sig = params["a"][i] + s
        h = jnp.exp(-(h * h) / (2.0 * sig * sig))
    w_out = params["w_out"].astype(matmul_dtype)
    out = jnp.dot(h.astype(matmul_dtype), w_out,
                  preferred_element_type=jnp.float32) + params["b_out"]
    return out.astype(x.dtype)


def init_params(key, n_hidden, input_dim, hidden_dim, output_dim, initial_values):
    params = {"w": [], "b": [], "a": []}
    for i in range(n_hidden):
        in_d = input_dim if i == 0 else hidden_dim
        key, kw, kb = jax.random.split(key, 3)
        params["w"].append(
            jax.random.normal(kw, (in_d, hidden_dim), jnp.float32) / jnp.sqrt(in_d))
        params["b"].append(jax.random.normal(kb, (hidden_dim,), jnp.float32) * 0.01)
        params["a"].append(jnp.full((hidden_dim,), initial_values, jnp.float32))
    key, kw, kb = jax.random.split(key, 3)
    params["w_out"] = (jax.random.normal(kw, (hidden_dim, output_dim), jnp.float32)
                       / jnp.sqrt(hidden_dim))
    params["b_out"] = jax.random.normal(kb, (output_dim,), jnp.float32) * 0.01
    return params


if __name__ == "__main__":
    n_hidden = 3
    input_dim = 16
    hidden_dim = 32
    output_dim = 8
    batch = 512            # tile_m caps at 256 here -> grid of 2 (both v7x TCs)
    initial_values = 0.1
    scale = 0.05

    key = jax.random.PRNGKey(0)
    key, kx = jax.random.split(key)
    x = jax.random.normal(kx, (batch, input_dim), jnp.float32)
    params = init_params(key, n_hidden, input_dim, hidden_dim, output_dim,
                         initial_values)

    # One-time prep (padding, bf16 cast, exact Gaussian coefficients).
    operands, meta = prepare_operands(params, n_hidden=n_hidden, scale=scale,
                                      matmul_dtype=jnp.bfloat16)

    out = gauss_act_mlp(x, operands, meta, n_hidden=n_hidden,
                        preferred_tile_m=1024)
    out = jax.block_until_ready(out)
    assert out.shape == (batch, output_dim)

    # Reference with the same bf16 MXU-operand precision (f32 accumulation).
    # With the exact precomputed coefficient, the only remaining difference is
    # bf16 operand rounding / accumulation order.
    ref = gauss_act_mlp_ref(x, params, n_hidden=n_hidden, scale=scale,
                            matmul_dtype=jnp.bfloat16)
    assert jnp.allclose(out, ref, atol=2e-2, rtol=2e-2), "mismatch vs reference"

    print("KERNEL_OK")
</pallas_src>

<mosaic_0001>
module attributes {stable_mosaic.version = 11 : i64} {
  func.func @kernel(%arg0: i32, %arg1: memref<256x16xf32, #tpu.memory_space<vmem>>, %arg2: memref<16x128xbf16, #tpu.memory_space<vmem>>, %arg3: memref<1x128xf32, #tpu.memory_space<vmem>>, %arg4: memref<1x128xf32, #tpu.memory_space<vmem>>, %arg5: memref<128x128xbf16, #tpu.memory_space<vmem>>, %arg6: memref<1x128xf32, #tpu.memory_space<vmem>>, %arg7: memref<1x128xf32, #tpu.memory_space<vmem>>, %arg8: memref<128x128xbf16, #tpu.memory_space<vmem>>, %arg9: memref<1x128xf32, #tpu.memory_space<vmem>>, %arg10: memref<1x128xf32, #tpu.memory_space<vmem>>, %arg11: memref<128x128xbf16, #tpu.memory_space<vmem>>, %arg12: memref<1x128xf32, #tpu.memory_space<vmem>>, %arg13: memref<256x128xf32, #tpu.memory_space<vmem>>) attributes {dimension_semantics = [#tpu.dimension_semantics<parallel>], iteration_bounds = array<i64: 2>, scalar_prefetch = 0 : i64, scratch_operands = 0 : i64, tpu.core_type = #tpu.core_type<tc>, window_params = [{transform_indices = @transform_0, window_bounds = array<i64: 256, 16>}, {pipeline_mode = #tpu.pipeline_mode<synchronous>, transform_indices = @transform_1, window_bounds = array<i64: 16, 128>}, {pipeline_mode = #tpu.pipeline_mode<synchronous>, transform_indices = @transform_2, window_bounds = array<i64: 1, 128>}, {pipeline_mode = #tpu.pipeline_mode<synchronous>, transform_indices = @transform_3, window_bounds = array<i64: 1, 128>}, {pipeline_mode = #tpu.pipeline_mode<synchronous>, transform_indices = @transform_4, window_bounds = array<i64: 128, 128>}, {pipeline_mode = #tpu.pipeline_mode<synchronous>, transform_indices = @transform_5, window_bounds = array<i64: 1, 128>}, {pipeline_mode = #tpu.pipeline_mode<synchronous>, transform_indices = @transform_6, window_bounds = array<i64: 1, 128>}, {pipeline_mode = #tpu.pipeline_mode<synchronous>, transform_indices = @transform_7, window_bounds = array<i64: 128, 128>}, {pipeline_mode = #tpu.pipeline_mode<synchronous>, transform_indices = @transform_8, window_bounds = array<i64: 1, 128>}, {pipeline_mode = #tpu.pipeline_mode<synchronous>, transform_indices = @transform_9, window_bounds = array<i64: 1, 128>}, {pipeline_mode = #tpu.pipeline_mode<synchronous>, transform_indices = @transform_10, window_bounds = array<i64: 128, 128>}, {pipeline_mode = #tpu.pipeline_mode<synchronous>, transform_indices = @transform_11, window_bounds = array<i64: 1, 128>}, {transform_indices = @transform_12, window_bounds = array<i64: 256, 128>}]} {
    %c0 = arith.constant 0 : index
    %c0_0 = arith.constant 0 : index
    %0 = vector.load %arg1[%c0, %c0_0] : memref<256x16xf32, #tpu.memory_space<vmem>>, vector<256x16xf32>
    %c0_1 = arith.constant 0 : index
    %c0_2 = arith.constant 0 : index
    %1 = vector.load %arg2[%c0_1, %c0_2] : memref<16x128xbf16, #tpu.memory_space<vmem>>, vector<16x128xbf16>
    %c0_3 = arith.constant 0 : index
    %c0_4 = arith.constant 0 : index
    %2 = vector.load %arg3[%c0_3, %c0_4] : memref<1x128xf32, #tpu.memory_space<vmem>>, vector<1x128xf32>
    %c0_5 = arith.constant 0 : index
    %c0_6 = arith.constant 0 : index
    %3 = vector.load %arg4[%c0_5, %c0_6] : memref<1x128xf32, #tpu.memory_space<vmem>>, vector<1x128xf32>
    %4 = arith.truncf %0 : vector<256x16xf32> to vector<256x16xbf16>
    %cst = arith.constant dense<0.000000e+00> : vector<256x128xf32>
    %5 = tpu.matmul %4, %1, %cst {dimension_numbers = #tpu.dot_dimension_numbers<[1], [0], [0], [1], [0, 0, 1, 1], [], []>} : vector<256x16xbf16>, vector<16x128xbf16>, vector<256x128xf32> -> vector<256x128xf32>
    %6 = vector.broadcast %2 : vector<1x128xf32> to vector<256x128xf32>
    %7 = arith.addf %5, %6 : vector<256x128xf32>
    %8 = arith.mulf %7, %7 : vector<256x128xf32>
    %9 = vector.broadcast %3 : vector<1x128xf32> to vector<256x128xf32>
    %10 = arith.mulf %8, %9 : vector<256x128xf32>
    %11 = math.exp %10 : vector<256x128xf32>
    %c0_7 = arith.constant 0 : index
    %c0_8 = arith.constant 0 : index
    %12 = vector.load %arg5[%c0_7, %c0_8] : memref<128x128xbf16, #tpu.memory_space<vmem>>, vector<128x128xbf16>
    %c0_9 = arith.constant 0 : index
    %c0_10 = arith.constant 0 : index
    %13 = vector.load %arg6[%c0_9, %c0_10] : memref<1x128xf32, #tpu.memory_space<vmem>>, vector<1x128xf32>
    %c0_11 = arith.constant 0 : index
    %c0_12 = arith.constant 0 : index
    %14 = vector.load %arg7[%c0_11, %c0_12] : memref<1x128xf32, #tpu.memory_space<vmem>>, vector<1x128xf32>
    %15 = arith.truncf %11 : vector<256x128xf32> to vector<256x128xbf16>
    %cst_13 = arith.constant dense<0.000000e+00> : vector<256x128xf32>
    %16 = tpu.matmul %15, %12, %cst_13 {dimension_numbers = #tpu.dot_dimension_numbers<[1], [0], [0], [1], [0, 0, 1, 1], [], []>} : vector<256x128xbf16>, vector<128x128xbf16>, vector<256x128xf32> -> vector<256x128xf32>
    %17 = vector.broadcast %13 : vector<1x128xf32> to vector<256x128xf32>
    %18 = arith.addf %16, %17 : vector<256x128xf32>
    %19 = arith.mulf %18, %18 : vector<256x128xf32>
    %20 = vector.broadcast %14 : vector<1x128xf32> to vector<256x128xf32>
    %21 = arith.mulf %19, %20 : vector<256x128xf32>
    %22 = math.exp %21 : vector<256x128xf32>
    %c0_14 = arith.constant 0 : index
    %c0_15 = arith.constant 0 : index
    %23 = vector.load %arg8[%c0_14, %c0_15] : memref<128x128xbf16, #tpu.memory_space<vmem>>, vector<128x128xbf16>
    %c0_16 = arith.constant 0 : index
    %c0_17 = arith.constant 0 : index
    %24 = vector.load %arg9[%c0_16, %c0_17] : memref<1x128xf32, #tpu.memory_space<vmem>>, vector<1x128xf32>
    %c0_18 = arith.constant 0 : index
    %c0_19 = arith.constant 0 : index
    %25 = vector.load %arg10[%c0_18, %c0_19] : memref<1x128xf32, #tpu.memory_space<vmem>>, vector<1x128xf32>
    %26 = arith.truncf %22 : vector<256x128xf32> to vector<256x128xbf16>
    %cst_20 = arith.constant dense<0.000000e+00> : vector<256x128xf32>
    %27 = tpu.matmul %26, %23, %cst_20 {dimension_numbers = #tpu.dot_dimension_numbers<[1], [0], [0], [1], [0, 0, 1, 1], [], []>} : vector<256x128xbf16>, vector<128x128xbf16>, vector<256x128xf32> -> vector<256x128xf32>
    %28 = vector.broadcast %24 : vector<1x128xf32> to vector<256x128xf32>
    %29 = arith.addf %27, %28 : vector<256x128xf32>
    %30 = arith.mulf %29, %29 : vector<256x128xf32>
    %31 = vector.broadcast %25 : vector<1x128xf32> to vector<256x128xf32>
    %32 = arith.mulf %30, %31 : vector<256x128xf32>
    %33 = math.exp %32 : vector<256x128xf32>
    %c0_21 = arith.constant 0 : index
    %c0_22 = arith.constant 0 : index
    %34 = vector.load %arg11[%c0_21, %c0_22] : memref<128x128xbf16, #tpu.memory_space<vmem>>, vector<128x128xbf16>
    %c0_23 = arith.constant 0 : index
    %c0_24 = arith.constant 0 : index
    %35 = vector.load %arg12[%c0_23, %c0_24] : memref<1x128xf32, #tpu.memory_space<vmem>>, vector<1x128xf32>
    %36 = arith.truncf %33 : vector<256x128xf32> to vector<256x128xbf16>
    %cst_25 = arith.constant dense<0.000000e+00> : vector<256x128xf32>
    %37 = tpu.matmul %36, %34, %cst_25 {dimension_numbers = #tpu.dot_dimension_numbers<[1], [0], [0], [1], [0, 0, 1, 1], [], []>} : vector<256x128xbf16>, vector<128x128xbf16>, vector<256x128xf32> -> vector<256x128xf32>
    %38 = vector.broadcast %35 : vector<1x128xf32> to vector<256x128xf32>
    %39 = arith.addf %37, %38 : vector<256x128xf32>
    %c0_26 = arith.constant 0 : index
    %c0_27 = arith.constant 0 : index
    %40 = vector.load %arg13[%c0_26, %c0_27] : memref<256x128xf32, #tpu.memory_space<vmem>>, vector<256x128xf32>
    tpu.vector_store %arg13[%c0_26, %c0_27], %39 {strides = array<i32>} : memref<256x128xf32, #tpu.memory_space<vmem>>, vector<256x128xf32>,
    return
  }
  func.func @transform_0(%arg0: i32) -> (i32, i32) {
    %c0_i32 = arith.constant 0 : i32
    %c0_i32_0 = arith.constant 0 : i32
    return %arg0, %c0_i32 : i32, i32
  }
  func.func @transform_1(%arg0: i32) -> (i32, i32) {
    %c0_i32 = arith.constant 0 : i32
    %c0_i32_0 = arith.constant 0 : i32
    %c0_i32_1 = arith.constant 0 : i32
    return %c0_i32, %c0_i32_0 : i32, i32
  }
  func.func @transform_2(%arg0: i32) -> (i32, i32) {
    %c0_i32 = arith.constant 0 : i32
    %c0_i32_0 = arith.constant 0 : i32
    %c0_i32_1 = arith.constant 0 : i32
    return %c0_i32, %c0_i32_0 : i32, i32
  }
  func.func @transform_3(%arg0: i32) -> (i32, i32) {
    %c0_i32 = arith.constant 0 : i32
    %c0_i32_0 = arith.constant 0 : i32
    %c0_i32_1 = arith.constant 0 : i32
    return %c0_i32, %c0_i32_0 : i32, i32
  }
  func.func @transform_4(%arg0: i32) -> (i32, i32) {
    %c0_i32 = arith.constant 0 : i32
    %c0_i32_0 = arith.constant 0 : i32
    %c0_i32_1 = arith.constant 0 : i32
    return %c0_i32, %c0_i32_0 : i32, i32
  }
  func.func @transform_5(%arg0: i32) -> (i32, i32) {
    %c0_i32 = arith.constant 0 : i32
    %c0_i32_0 = arith.constant 0 : i32
    %c0_i32_1 = arith.constant 0 : i32
    return %c0_i32, %c0_i32_0 : i32, i32
  }
  func.func @transform_6(%arg0: i32) -> (i32, i32) {
    %c0_i32 = arith.constant 0 : i32
    %c0_i32_0 = arith.constant 0 : i32
    %c0_i32_1 = arith.constant 0 : i32
    return %c0_i32, %c0_i32_0 : i32, i32
  }
  func.func @transform_7(%arg0: i32) -> (i32, i32) {
    %c0_i32 = arith.constant 0 : i32
    %c0_i32_0 = arith.constant 0 : i32
    %c0_i32_1 = arith.constant 0 : i32
    return %c0_i32, %c0_i32_0 : i32, i32
  }
  func.func @transform_8(%arg0: i32) -> (i32, i32) {
    %c0_i32 = arith.constant 0 : i32
    %c0_i32_0 = arith.constant 0 : i32
    %c0_i32_1 = arith.constant 0 : i32
    return %c0_i32, %c0_i32_0 : i32, i32
  }
  func.func @transform_9(%arg0: i32) -> (i32, i32) {
    %c0_i32 = arith.constant 0 : i32
    %c0_i32_0 = arith.constant 0 : i32
    %c0_i32_1 = arith.constant 0 : i32
    return %c0_i32, %c0_i32_0 : i32, i32
  }
  func.func @transform_10(%arg0: i32) -> (i32, i32) {
    %c0_i32 = arith.constant 0 : i32
    %c0_i32_0 = arith.constant 0 : i32
    %c0_i32_1 = arith.constant 0 : i32
    return %c0_i32, %c0_i32_0 : i32, i32
  }
  func.func @transform_11(%arg0: i32) -> (i32, i32) {
    %c0_i32 = arith.constant 0 : i32
    %c0_i32_0 = arith.constant 0 : i32
    %c0_i32_1 = arith.constant 0 : i32
    return %c0_i32, %c0_i32_0 : i32, i32
  }
  func.func @transform_12(%arg0: i32) -> (i32, i32) {
    %c0_i32 = arith.constant 0 : i32
    %c0_i32_0 = arith.constant 0 : i32
    return %arg0, %c0_i32 : i32, i32
  }
}

</mosaic_0001>

<bundles_post_ra>
// kernel: _forward.1
= control target key start
LH: loop header
LB: loop body
LE: loop exit
PB: predicated region body
PF: predicated region fallthrough
CT: control target
= control target key end

     0   :  { %s2568_s21 = smov 0   ;;  %s3034_s0 = inlined_call_operand.vmem [shape: f32[512,16], index: 0, kind: input, shape index: {}]   ;;  %s3035_s1 = inlined_call_operand.vmem [shape: bf16[16,128], index: 1, kind: input, shape index: {}]   ;;  %s3036_s2 = inlined_call_operand.vmem [shape: f32[1,128], index: 2, kind: input, shape index: {}]   ;;  %s3037_s3 = inlined_call_operand.vmem [shape: f32[1,128], index: 3, kind: input, shape index: {}]   ;;  %s3038_s4 = inlined_call_operand.vmem [shape: bf16[128,128], index: 4, kind: input, shape index: {}]   ;;  %s3039_s5 = inlined_call_operand.vmem [shape: f32[1,128], index: 5, kind: input, shape index: {}]   ;;  %s3040_s6 = inlined_call_operand.vmem [shape: f32[1,128], index: 6, kind: input, shape index: {}]   ;;  %s3041_s7 = inlined_call_operand.vmem [shape: bf16[128,128], index: 7, kind: input, shape index: {}]   ;;  %s3042_s8 = inlined_call_operand.vmem [shape: f32[1,128], index: 8, kind: input, shape index: {}]   ;;  %s3043_s9 = inlined_call_operand.vmem [shape: f32[1,128], index: 9, kind: input, shape index: {}]   ;;  %s3044_s10 = inlined_call_operand.vmem [shape: bf16[128,128], index: 10, kind: input, shape index: {}]   ;;  %s3045_s11 = inlined_call_operand.vmem [shape: f32[1,128], index: 11, kind: input, shape index: {}]   ;;  %s3046_s12 = inlined_call_operand.vmem [shape: f32[512,128], index: 12, kind: output, shape index: {}]  }
   0x1 LB: > { %s1928_s22 = sadd.s32 4294967295, %s2501_s21   ;;  %p1932_p0 = scmp.ge.s32.totalorder %s2501_s21, 1  ;;  %s2501_s21 = sphi %s2568_s21, %s22_s21  }
   0x2   : > { %p363_p1 = scmp.lt.s32.totalorder %s2501_s21, 3 }
   0x4   : > { %p364_p2 = pnand %p1932_p0, %p363_p1 }
   0x5   : > { %s1933_s25 = sshll.u32 (!%p364_p2), %s1928_s22, 5 }
   0x6   : > { %367 = sbr.rel (%p364_p2) target bundleno = 951 (0x3b7), region = 68  ;;  %p406_p3 = scmp.lt.s32.totalorder (!%p364_p2), %s1933_s25, 63 }
   0xb   : > { %v2278_v0 = vld [vmem:[%s3035_s1] sm:$0xff]   ;;  %s3048_s25 = smov (!%p406_p3, %s1933_s25), 63  ;;  %vm482_vm0 = vcmask 130048   ;;  %v2279_v49 = vld [vmem:[%s3038_s4 + $0x38] sm:$0xff]   ;;  %v2280_v50 = vld [vmem:[%s3038_s4 + $0x30] sm:$0xff]  }
   0xc   : > { %2076 = vmatprep.subr.bf16.mxu0 %v2278_v0  ;;  %s1934_s26 = sshll.u32 %s3048_s25, 3  ;;  %2110 = vmatprep.subr.bf16.mxu1 %v2279_v49  ;;  %v2281_v51 = vld [vmem:[%s3038_s4 + $0x28] sm:$0xff]   ;;  %v2282_v52 = vld [vmem:[%s3038_s4 + $0x20] sm:$0xff]   ;;  %v2283_v53 = vld [vmem:[%s3038_s4 + $0x18] sm:$0xff]  }
   0xd   : > { %2077 = vmatpush3.bf16.msra.mxu0 %v2278_v0  ;;  %s2587_s29 = scalar_lea.vmem %s3034_s0, %s1934_s26  ;;  %2111 = vmatpush3.bf16.msra.mxu1 %v2279_v49  ;;  %v2284_v54 = vld [vmem:[%s3038_s4 + $0x10] sm:$0xff]   ;;  %v2285_v55 = vld [vmem:[%s3038_s4 + $0x8] sm:$0xff]   ;;  %v2286_v56 = vld [vmem:[%s3038_s4] sm:$0xff]   ;;  %s2965_s16 = scalar_lea.vmem %s3046_s12, %s1934_s26 }
   0xe   : > { %v418_v1 = vld [vmem:[%s2587_s29] sm:$0xff]  ;;  %v419_v2 = vld [vmem:[%s2587_s29 + $0x8] sm:$0xff]  ;;  %v420_v3 = vld [vmem:[%s2587_s29 + $0x10] sm:$0xff]  ;;  %2112 = vmatprep.subr.bf16.mxu1 %v2280_v50 }
   0xf   : > { %v454_v4 = vpack.c.bf16 %v419_v2, %v418_v1  ;;  %v421_v5 = vld [vmem:[%s2587_s29 + $0x18] sm:$0xff]  ;;  %v422_v6 = vld [vmem:[%s2587_s29 + $0x20] sm:$0xff]  ;;  %v423_v7 = vld [vmem:[%s2587_s29 + $0x28] sm:$0xff] }
  0x10   : > { %v455_v8 = vpack.c.bf16 %v421_v5, %v420_v3  ;;  %v456_v9 = vpack.c.bf16 %v423_v7, %v422_v6  ;;  %v424_v10 = vld [vmem:[%s2587_s29 + $0x30] sm:$0xff]  ;;  %v425_v11 = vld [vmem:[%s2587_s29 + $0x38] sm:$0xff]  ;;  %v426_v12 = vld [vmem:[%s2587_s29 + $0x40] sm:$0xff] }
  0x11   : > { %2078 = vmatprep.mubr.msk.bf16.mxu0 %vm482_vm0, %v454_v4  ;;  %v427_v13 = vld [vmem:[%s2587_s29 + $0x48] sm:$0xff]  ;;  %v457_v14 = vpack.c.bf16 %v425_v11, %v424_v10  ;;  %v428_v16 = vld [vmem:[%s2587_s29 + $0x50] sm:$0xff]  ;;  %v429_v17 = vld [vmem:[%s2587_s29 + $0x58] sm:$0xff]  ;;  %2113 = vmatpush3.bf16.msra.mxu1 %v2280_v50 }
  0x12   : > { %2079 = vmatmul.mubr.msk.bf16.vlgmr.msra.gmra.mxu0 %vm482_vm0, %v455_v8  ;;  %v458_v15 = vpack.c.bf16 %v427_v13, %v426_v12  ;;  %v430_v18 = vld [vmem:[%s2587_s29 + $0x60] sm:$0xff]  ;;  %v431_v19 = vld [vmem:[%s2587_s29 + $0x68] sm:$0xff]  ;;  %v459_v20 = vpack.c.bf16 %v429_v17, %v428_v16  ;;  %v432_v22 = vld [vmem:[%s2587_s29 + $0x70] sm:$0xff]  ;;  %2114 = vmatprep.subr.bf16.mxu1 %v2281_v51 }
  0x13   : > { %2082 = vmatprep.mubr.msk.bf16.mxu0 %vm482_vm0, %v456_v9  ;;  %v460_v21 = vpack.c.bf16 %v431_v19, %v430_v18  ;;  %v433_v23 = vld [vmem:[%s2587_s29 + $0x78] sm:$0xff]  ;;  %v434_v24 = vld [vmem:[%s2587_s29 + $0x80] sm:$0xff]  ;;  %v435_v25 = vld [vmem:[%s2587_s29 + $0x88] sm:$0xff] }
  0x14   : > { %v461_v26 = vpack.c.bf16 %v433_v23, %v432_v22  ;;  %v462_v27 = vpack.c.bf16 %v435_v25, %v434_v24  ;;  %v436_v28 = vld [vmem:[%s2587_s29 + $0x90] sm:$0xff]  ;;  %v437_v29 = vld [vmem:[%s2587_s29 + $0x98] sm:$0xff]  ;;  %v438_v30 = vld [vmem:[%s2587_s29 + $0xa0] sm:$0xff] }
  0x15   : > { %v439_v31 = vld [vmem:[%s2587_s29 + $0xa8] sm:$0xff]  ;;  %v463_v32 = vpack.c.bf16 %v437_v29, %v436_v28  ;;  %v440_v34 = vld [vmem:[%s2587_s29 + $0xb0] sm:$0xff]  ;;  %v441_v35 = vld [vmem:[%s2587_s29 + $0xb8] sm:$0xff]  ;;  %2115 = vmatpush3.bf16.msra.mxu1 %v2281_v51 }
  0x16   : > { %v464_v33 = vpack.c.bf16 %v439_v31, %v438_v30  ;;  %v442_v36 = vld [vmem:[%s2587_s29 + $0xc0] sm:$0xff]  ;;  %v443_v37 = vld [vmem:[%s2587_s29 + $0xc8] sm:$0xff]  ;;  %v465_v38 = vpack.c.bf16 %v441_v35, %v440_v34  ;;  %v444_v40 = vld [vmem:[%s2587_s29 + $0xd0] sm:$0xff]  ;;  %2116 = vmatprep.subr.bf16.mxu1 %v2282_v52 }
  0x17   : > { %v466_v39 = vpack.c.bf16 %v443_v37, %v442_v36  ;;  %v445_v41 = vld [vmem:[%s2587_s29 + $0xd8] sm:$0xff]  ;;  %v446_v42 = vld [vmem:[%s2587_s29 + $0xe0] sm:$0xff]  ;;  %v447_v43 = vld [vmem:[%s2587_s29 + $0xe8] sm:$0xff] }
  0x18   : > { %v467_v44 = vpack.c.bf16 %v445_v41, %v444_v40  ;;  %v468_v45 = vpack.c.bf16 %v447_v43, %v446_v42  ;;  %v448_v46 = vld [vmem:[%s2587_s29 + $0xf0] sm:$0xff]  ;;  %v449_v47 = vld [vmem:[%s2587_s29 + $0xf8] sm:$0xff]  ;;  %v2289_v59 = vld [vmem:[%s3041_s7 + $0x28] sm:$0xff]  }
  0x19   : > { %v469_v48 = vpack.c.bf16 %v449_v47, %v448_v46  ;;  %2117 = vmatpush3.bf16.msra.mxu1 %v2282_v52  ;;  %v2287_v57 = vld [vmem:[%s3041_s7 + $0x38] sm:$0xff]   ;;  %v2288_v58 = vld [vmem:[%s3041_s7 + $0x30] sm:$0xff]   ;;  %v2290_v60 = vld [vmem:[%s3041_s7 + $0x20] sm:$0xff]  }
  0x1a   : > { %2083 = vmatmul.mubr.msk.bf16.gmra.mxu0 %vm482_vm0, %v457_v14  ;;  %2118 = vmatprep.subr.bf16.mxu1 %v2283_v53  ;;  %v2291_v61 = vld [vmem:[%s3041_s7 + $0x18] sm:$0xff]   ;;  %v2679_v62 = vld [vmem:[%s3036_s2] ss:$0 sm:$0xff] }
  0x1b   : > { %2086 = vmatprep.mubr.msk.bf16.mxu0 %vm482_vm0, %v458_v15  ;;  %2158 = vmatprep.subr.bf16.mxu0 %v2287_v57  ;;  %v2685_v1 = vld [vmem:[%s3037_s3] ss:$0 sm:$0xff] }
  0x1c   : > { %2159 = vmatpush3.bf16.msra.mxu0 %v2287_v57 }
  0x1d   : > { %2119 = vmatpush3.bf16.msra.mxu1 %v2283_v53  ;;  %2160 = vmatprep.subr.bf16.mxu0 %v2288_v58 }
  0x1e   : > { %2120 = vmatprep.subr.bf16.mxu1 %v2284_v54 }
  0x20   : > { %2161 = vmatpush3.bf16.msra.mxu0 %v2288_v58 }
  0x21   : > { %2121 = vmatpush3.bf16.msra.mxu1 %v2284_v54  ;;  %2162 = vmatprep.subr.bf16.mxu0 %v2289_v59 }
  0x22   : > { %2087 = vmatmul.mubr.msk.bf16.gmra.mxu0 %vm482_vm0, %v459_v20  ;;  %2122 = vmatprep.subr.bf16.mxu1 %v2285_v55 }
  0x23   : > { %2090 = vmatprep.mubr.msk.bf16.mxu0 %vm482_vm0, %v460_v21 }
  0x24   : > { %2163 = vmatpush3.bf16.msra.mxu0 %v2289_v59 }
  0x25   : > { %2123 = vmatpush3.bf16.msra.mxu1 %v2285_v55  ;;  %2164 = vmatprep.subr.bf16.mxu0 %v2290_v60 }
  0x26   : > { %2124 = vmatprep.subr.bf16.mxu1 %v2286_v56 }
  0x28   : > { %2165 = vmatpush3.bf16.msra.mxu0 %v2290_v60 }
  0x29   : > { %2125 = vmatpush3.bf16.msra.mxu1 %v2286_v56  ;;  %2166 = vmatprep.subr.bf16.mxu0 %v2291_v61 }
  0x2a   : > { %2091 = vmatmul.mubr.msk.bf16.gmra.mxu0 %vm482_vm0, %v461_v26 }
  0x2b   : > { %2094 = vmatprep.mubr.msk.bf16.mxu0 %vm482_vm0, %v462_v27 }
  0x2c   : > { %2167 = vmatpush3.bf16.msra.mxu0 %v2291_v61 }
  0x32   : > { %2095 = vmatmul.mubr.msk.bf16.gmra.mxu0 %vm482_vm0, %v463_v32 }
  0x33   : > { %2098 = vmatprep.mubr.msk.bf16.mxu0 %vm482_vm0, %v464_v33 }
  0x3a   : > { %2099 = vmatmul.mubr.msk.bf16.gmra.mxu0 %vm482_vm0, %v465_v38 }
  0x3b   : > { %2102 = vmatprep.mubr.msk.bf16.mxu0 %vm482_vm0, %v466_v39 }
  0x42   : > { %2103 = vmatmul.mubr.msk.bf16.gmra.mxu0 %vm482_vm0, %v467_v44 }
  0x43   : > { %2106 = vmatprep.mubr.msk.bf16.mxu0 %vm482_vm0, %v468_v45 }
  0x4a   : > { %2107 = vmatmul.mubr.msk.bf16.gmra.mxu0 %vm482_vm0, %v469_v48 }
  0xd2   : > { %v2080_v63 = vpop.f32.mrf.mxu0 }
  0xd3   : > { %v574_v0 = vadd.f32 %v2080_v63, %v2679_v62 }
  0xd4   : > { %v565_v2 = vpop.f32.mrf.mxu0 }
  0xd5   : > { %v694_v3 = vmul.f32 %v574_v0, %v574_v0  ;;  %v566_v4 = vadd.f32 %v2679_v62, %v565_v2 }
  0xd6   : > { %v2081_v5 = vpop.f32.mrf.mxu0 }
  0xd7   : > { %v732_v6 = vmul.f32 %v2685_v1, %v694_v3  ;;  %v692_v7 = vmul.f32 %v566_v4, %v566_v4  ;;  %v577_v8 = vadd.f32 %v2081_v5, %v2679_v62 }
  0xd8   : > { %v568_v9 = vpop.f32.mrf.mxu0 }
  0xd9   : > { %v695_v10 = vmul.f32 %v577_v8, %v577_v8  ;;  %v569_v11 = vadd.f32 %v2679_v62, %v568_v9  ;;  %v730_v12 = vmul.f32 %v2685_v1, %v692_v7  ;;  %v766_v14 = vmul.f32 1.442695, %v732_v6 }
  0xda   : > { %v2084_v13 = vpop.f32.mrf.mxu0 }
  0xdb   : > { %v733_v15 = vmul.f32 %v2685_v1, %v695_v10  ;;  %v693_v16 = vmul.f32 %v569_v11, %v569_v11  ;;  %v590_v17 = vadd.f32 %v2084_v13, %v2679_v62  ;;  %v762_v22 = vmul.f32 1.442695, %v730_v12 }
  0xdc   : > { %v581_v18 = vpop.f32.mrf.mxu0  ;;  %2303 = vpow2.f32 %v766_v14 }
  0xdd   : > { %v768_v19 = vmul.f32 1.442695, %v733_v15  ;;  %v731_v20 = vmul.f32 %v2685_v1, %v693_v16  ;;  %v582_v21 = vadd.f32 %v2679_v62, %v581_v18  ;;  %v698_v23 = vmul.f32 %v590_v17, %v590_v17 }
  0xde   : > { %v2085_v24 = vpop.f32.mrf.mxu0 }
  0xdf   : > { %v764_v25 = vmul.f32 1.442695, %v731_v20  ;;  %v696_v26 = vmul.f32 %v582_v21, %v582_v21  ;;  %v593_v27 = vadd.f32 %v2085_v24, %v2679_v62  ;;  %2305 = vpow2.f32 %v768_v19 }
  0xe0   : > { %v736_v28 = vmul.f32 %v2685_v1, %v698_v23  ;;  %v584_v29 = vpop.f32.mrf.mxu0 }
  0xe1   : > { %2307 = vpow2.f32 %v764_v25  ;;  %v699_v30 = vmul.f32 %v593_v27, %v593_v27  ;;  %v585_v31 = vadd.f32 %v2679_v62, %v584_v29  ;;  %v734_v32 = vmul.f32 %v2685_v1, %v696_v26 }
  0xe2   : > { %2309 = vpow2.f32 %v762_v22  ;;  %v2088_v33 = vpop.f32.mrf.mxu0  ;;  %v774_v34 = vmul.f32 1.442695, %v736_v28 }
  0xe3   : > { %v737_v35 = vmul.f32 %v2685_v1, %v699_v30  ;;  %v697_v36 = vmul.f32 %v585_v31, %v585_v31  ;;  %v606_v37 = vadd.f32 %v2088_v33, %v2679_v62  ;;  %v770_v42 = vmul.f32 1.442695, %v734_v32 }
  0xe4   : > { %v597_v38 = vpop.f32.mrf.mxu0  ;;  %2311 = vpow2.f32 %v774_v34 }
  0xe5   : > { %v776_v39 = vmul.f32 1.442695, %v737_v35  ;;  %v735_v40 = vmul.f32 %v2685_v1, %v697_v36  ;;  %v702_v41 = vmul.f32 %v606_v37, %v606_v37  ;;  %v598_v43 = vadd.f32 %v2679_v62, %v597_v38 }
  0xe6   : > { %v2089_v44 = vpop.f32.mrf.mxu0 }
  0xe7   : > { %v772_v45 = vmul.f32 1.442695, %v735_v40  ;;  %v740_v46 = vmul.f32 %v2685_v1, %v702_v41  ;;  %v609_v47 = vadd.f32 %v2089_v44, %v2679_v62  ;;  %2313 = vpow2.f32 %v776_v39 }
  0xe8   : > { %v700_v48 = vmul.f32 %v598_v43, %v598_v43  ;;  %v600_v49 = vpop.f32.mrf.mxu0 }
  0xe9   : > { %2315 = vpow2.f32 %v772_v45  ;;  %v703_v50 = vmul.f32 %v609_v47, %v609_v47  ;;  %v601_v51 = vadd.f32 %v2679_v62, %v600_v49  ;;  %v782_v54 = vmul.f32 1.442695, %v740_v46  ;;  %v2304_v58 = vpop.eup %2303 }
  0xea   : > { %2317 = vpow2.f32 %v770_v42  ;;  %v738_v52 = vmul.f32 %v2685_v1, %v700_v48  ;;  %v2092_v53 = vpop.f32.mrf.mxu0 }
  0xeb   : > { %v741_v55 = vmul.f32 %v2685_v1, %v703_v50  ;;  %v701_v56 = vmul.f32 %v601_v51, %v601_v51  ;;  %v622_v57 = vadd.f32 %v2092_v53, %v2679_v62  ;;  %2319 = vpow2.f32 %v782_v54 }
  0xec   : > { %v613_v59 = vpop.f32.mrf.mxu0  ;;  %v2306_v60 = vpop.eup %2305  ;;  %v778_v4 = vmul.f32 1.442695, %v738_v52 }
  0xed   : > { %v784_v61 = vmul.f32 1.442695, %v741_v55  ;;  %v739_v63 = vmul.f32 %v2685_v1, %v701_v56  ;;  %v706_v0 = vmul.f32 %v622_v57, %v622_v57  ;;  %v614_v2 = vadd.f32 %v2679_v62, %v613_v59 }
  0xee   : > { %v2308_v3 = vpop.eup %2307  ;;  %v2093_v5 = vpop.f32.mrf.mxu0  ;;  %v845_v14 = vpack.c.bf16 %v2306_v60, %v2304_v58 }
  0xef   : > { %v2310_v6 = vpop.eup %2309  ;;  %v780_v7 = vmul.f32 1.442695, %v739_v63  ;;  %v744_v8 = vmul.f32 %v2685_v1, %v706_v0  ;;  %v704_v9 = vmul.f32 %v614_v2, %v614_v2  ;;  %2321 = vpow2.f32 %v784_v61 }
  0xf0   : > { %v625_v10 = vadd.f32 %v2093_v5, %v2679_v62  ;;  %v616_v11 = vpop.f32.mrf.mxu0  ;;  %v844_v12 = vpack.c.bf16 %v2308_v3, %v2310_v6 }
  0xf1   : > { %2323 = vpow2.f32 %v780_v7  ;;  %v617_v13 = vadd.f32 %v2679_v62, %v616_v11  ;;  %v790_v15 = vmul.f32 1.442695, %v744_v8  ;;  %v742_v16 = vmul.f32 %v2685_v1, %v704_v9  ;;  %v2312_v21 = vpop.eup %2311 }
  0xf2   : > { %2325 = vpow2.f32 %v778_v4  ;;  %v707_v17 = vmul.f32 %v625_v10, %v625_v10  ;;  %2126 = vmatprep.mubr.bf16.mxu1 %v844_v12  ;;  %v2096_v18 = vpop.f32.mrf.mxu0 }
  0xf3   : > { %v705_v19 = vmul.f32 %v617_v13, %v617_v13  ;;  %v638_v20 = vadd.f32 %v2096_v18, %v2679_v62  ;;  %2127 = vmatmul.mubr.bf16.vlgmr.msra.gmra.mxu1 %v845_v14  ;;  %2327 = vpow2.f32 %v790_v15  ;;  %v786_v28 = vmul.f32 1.442695, %v742_v16 }
  0xf4   : > { %v745_v22 = vmul.f32 %v2685_v1, %v707_v17  ;;  %v629_v23 = vpop.f32.mrf.mxu0  ;;  %v2314_v24 = vpop.eup %2313 }
  0xf5   : > { %v743_v25 = vmul.f32 %v2685_v1, %v705_v19  ;;  %v630_v26 = vadd.f32 %v2679_v62, %v629_v23  ;;  %v710_v33 = vmul.f32 %v638_v20, %v638_v20  ;;  %v847_v40 = vpack.c.bf16 %v2314_v24, %v2312_v21 }
  0xf6   : > { %v2316_v27 = vpop.eup %2315  ;;  %v792_v29 = vmul.f32 1.442695, %v745_v22  ;;  %v2097_v30 = vpop.f32.mrf.mxu0 }
  0xf7   : > { %v2318_v31 = vpop.eup %2317  ;;  %v788_v32 = vmul.f32 1.442695, %v743_v25  ;;  %v708_v34 = vmul.f32 %v630_v26, %v630_v26  ;;  %v641_v35 = vadd.f32 %v2097_v30, %v2679_v62  ;;  %v748_v43 = vmul.f32 %v2685_v1, %v710_v33 }
  0xf8   : > { %2329 = vpow2.f32 %v792_v29  ;;  %v632_v36 = vpop.f32.mrf.mxu0  ;;  %v846_v37 = vpack.c.bf16 %v2316_v27, %v2318_v31  ;;  %v2320_v46 = vpop.eup %2319 }
  0xf9   : > { %2331 = vpow2.f32 %v788_v32  ;;  %v746_v38 = vmul.f32 %v2685_v1, %v708_v34  ;;  %v711_v39 = vmul.f32 %v641_v35, %v641_v35  ;;  %v633_v41 = vadd.f32 %v2679_v62, %v632_v36 }
  0xfa   : > { %2333 = vpow2.f32 %v786_v28  ;;  %2130 = vmatprep.mubr.bf16.mxu1 %v846_v37  ;;  %v2100_v42 = vpop.f32.mrf.mxu0  ;;  %v798_v58 = vmul.f32 1.442695, %v748_v43 }
  0xfb   : > { %v749_v44 = vmul.f32 %v2685_v1, %v711_v39  ;;  %v654_v45 = vadd.f32 %v2100_v42, %v2679_v62  ;;  %2131 = vmatmul.mubr.bf16.gmra.mxu1 %v847_v40  ;;  %v794_v47 = vmul.f32 1.442695, %v746_v38  ;;  %v709_v48 = vmul.f32 %v633_v41, %v633_v41 }
  0xfc   : > { %v645_v49 = vpop.f32.mrf.mxu0  ;;  %v2322_v50 = vpop.eup %2321 }
  0xfd   : > { %v800_v51 = vmul.f32 1.442695, %v749_v44  ;;  %v646_v52 = vadd.f32 %v2679_v62, %v645_v49  ;;  %v747_v54 = vmul.f32 %v2685_v1, %v709_v48  ;;  %v714_v55 = vmul.f32 %v654_v45, %v654_v45 }
  0xfe   : > { %v2324_v53 = vpop.eup %2323  ;;  %v2101_v56 = vpop.f32.mrf.mxu0  ;;  %2335 = vpow2.f32 %v794_v47  ;;  %v849_v2 = vpack.c.bf16 %v2322_v50, %v2320_v46 }
  0xff   : > { %v2326_v57 = vpop.eup %2325  ;;  %v712_v59 = vmul.f32 %v646_v52, %v646_v52  ;;  %v657_v60 = vadd.f32 %v2101_v56, %v2679_v62  ;;  %v796_v61 = vmul.f32 1.442695, %v747_v54  ;;  %2337 = vpow2.f32 %v800_v51 }
 0x100   : > { %v648_v63 = vpop.f32.mrf.mxu0  ;;  %v848_v0 = vpack.c.bf16 %v2324_v53, %v2326_v57  ;;  %v752_v6 = vmul.f32 %v2685_v1, %v714_v55  ;;  %v2328_v8 = vpop.eup %2327 }
 0x101   : > { %v750_v3 = vmul.f32 %v2685_v1, %v712_v59  ;;  %v715_v4 = vmul.f32 %v657_v60, %v657_v60  ;;  %v649_v5 = vadd.f32 %v2679_v62, %v648_v63  ;;  %2339 = vpow2.f32 %v796_v61 }
 0x102   : > { %2134 = vmatprep.mubr.bf16.mxu1 %v848_v0  ;;  %v2104_v7 = vpop.f32.mrf.mxu0  ;;  %2341 = vpow2.f32 %v798_v58  ;;  %v806_v19 = vmul.f32 1.442695, %v752_v6 }
 0x103   : > { %v802_v9 = vmul.f32 1.442695, %v750_v3  ;;  %v753_v10 = vmul.f32 %v2685_v1, %v715_v4  ;;  %v713_v11 = vmul.f32 %v649_v5, %v649_v5  ;;  %2135 = vmatmul.mubr.bf16.gmra.mxu1 %v849_v2  ;;  %v670_v12 = vadd.f32 %v2104_v7, %v2679_v62 }
 0x104   : > { %v661_v13 = vpop.f32.mrf.mxu0 }
 0x105   : > { %v2330_v14 = vpop.eup %2329  ;;  %v808_v15 = vmul.f32 1.442695, %v753_v10  ;;  %v751_v16 = vmul.f32 %v2685_v1, %v713_v11  ;;  %v662_v17 = vadd.f32 %v2679_v62, %v661_v13  ;;  %v718_v20 = vmul.f32 %v670_v12, %v670_v12 }
 0x106   : > { %v2332_v18 = vpop.eup %2331  ;;  %v2105_v21 = vpop.f32.mrf.mxu0  ;;  %2343 = vpow2.f32 %v802_v9  ;;  %v851_v28 = vpack.c.bf16 %v2330_v14, %v2328_v8 }
 0x107   : > { %v2334_v22 = vpop.eup %2333  ;;  %v804_v23 = vmul.f32 1.442695, %v751_v16  ;;  %v716_v24 = vmul.f32 %v662_v17, %v662_v17  ;;  %v673_v25 = vadd.f32 %v2105_v21, %v2679_v62  ;;  %2345 = vpow2.f32 %v808_v15  ;;  %v2293_v21 = vld [vmem:[%s3041_s7 + $0x8] sm:$0xff]  }
 0x108   : > { %v664_v26 = vpop.f32.mrf.mxu0  ;;  %v850_v27 = vpack.c.bf16 %v2332_v18, %v2334_v22  ;;  %v756_v32 = vmul.f32 %v2685_v1, %v718_v20  ;;  %v2292_v20 = vld [vmem:[%s3041_s7 + $0x10] sm:$0xff]   ;;  %v2294_v22 = vld [vmem:[%s3041_s7] sm:$0xff]  }
 0x109   : > { %2347 = vpow2.f32 %v804_v23  ;;  %v754_v29 = vmul.f32 %v2685_v1, %v716_v24  ;;  %v719_v30 = vmul.f32 %v673_v25, %v673_v25  ;;  %v665_v31 = vadd.f32 %v2679_v62, %v664_v26  ;;  %2168 = vmatprep.subr.bf16.mxu0 %v2292_v20  ;;  %v2762_v23 = vld [vmem:[%s3044_s10 + $0x38] sm:$0xff]   ;;  %v2768_v24 = vld [vmem:[%s3044_s10 + $0x30] sm:$0xff]   ;;  %v2776_v25 = vld [vmem:[%s3044_s10 + $0x28] sm:$0xff]  }
 0x10a   : > { %2349 = vpow2.f32 %v806_v19  ;;  %2138 = vmatprep.mubr.bf16.mxu1 %v850_v27  ;;  %v2108_v33 = vpop.f32.mrf.mxu0  ;;  %v814_v43 = vmul.f32 1.442695, %v756_v32  ;;  %2169 = vmatpush3.bf16.msra.mxu0 %v2292_v20  ;;  %v2783_v26 = vld [vmem:[%s3044_s10 + $0x20] sm:$0xff]  }
 0x10b   : > { %v810_v34 = vmul.f32 1.442695, %v754_v29  ;;  %v757_v35 = vmul.f32 %v2685_v1, %v719_v30  ;;  %v717_v36 = vmul.f32 %v665_v31, %v665_v31  ;;  %v686_v37 = vadd.f32 %v2108_v33, %v2679_v62  ;;  %2139 = vmatmul.mubr.bf16.gmra.mxu1 %v851_v28  ;;  %v2336_v39 = vpop.eup %2335  ;;  %2170 = vmatprep.subr.bf16.mxu0 %v2293_v21  ;;  %v2791_v27 = vld [vmem:[%s3039_s5] ss:$0 sm:$0xff] }
 0x10c   : > { %v677_v38 = vpop.f32.mrf.mxu0  ;;  %v2338_v42 = vpop.eup %2337  ;;  %2254 = vmatprep.subr.bf16.mxu1 %v2762_v23  ;;  %v2797_v30 = vld [vmem:[%s3040_s6] ss:$0 sm:$0xff] }
 0x10d   : > { %v816_v40 = vmul.f32 1.442695, %v757_v35  ;;  %v755_v41 = vmul.f32 %v2685_v1, %v717_v36  ;;  %v678_v44 = vadd.f32 %v2679_v62, %v677_v38  ;;  %2351 = vpow2.f32 %v810_v34  ;;  %2262 = vmatpush3.bf16.msra.mxu1 %v2762_v23 }
 0x10e   : > { %v2109_v45 = vpop.f32.mrf.mxu0  ;;  %v2340_v46 = vpop.eup %2339  ;;  %v722_v48 = vmul.f32 %v686_v37, %v686_v37  ;;  %2171 = vmatpush3.bf16.msra.mxu0 %v2293_v21  ;;  %2255 = vmatprep.subr.bf16.mxu1 %v2768_v24 }
 0x10f   : > { %v812_v47 = vmul.f32 1.442695, %v755_v41  ;;  %v689_v49 = vadd.f32 %v2109_v45, %v2679_v62  ;;  %v2342_v50 = vpop.eup %2341  ;;  %2353 = vpow2.f32 %v816_v40  ;;  %v720_v51 = vmul.f32 %v678_v44, %v678_v44  ;;  %2172 = vmatprep.subr.bf16.mxu0 %v2294_v22 }
 0x110   : > { %v680_v52 = vpop.f32.mrf.mxu0  ;;  %v852_v53 = vpack.c.bf16 %v2340_v46, %v2336_v39  ;;  %v853_v56 = vpack.c.bf16 %v2338_v42, %v2342_v50  ;;  %v760_v58 = vmul.f32 %v2685_v1, %v722_v48 }
 0x111   : > { %2355 = vpow2.f32 %v812_v47  ;;  %v723_v54 = vmul.f32 %v689_v49, %v689_v49  ;;  %v681_v55 = vadd.f32 %v2679_v62, %v680_v52  ;;  %v758_v57 = vmul.f32 %v2685_v1, %v720_v51  ;;  %2263 = vmatpush3.bf16.msra.mxu1 %v2768_v24 }
 0x112   : > { %2142 = vmatprep.mubr.bf16.mxu1 %v852_v53  ;;  %2357 = vpow2.f32 %v814_v43  ;;  %v822_v62 = vmul.f32 1.442695, %v760_v58  ;;  %2173 = vmatpush3.bf16.msra.mxu0 %v2294_v22 }
 0x113   : > { %v761_v59 = vmul.f32 %v2685_v1, %v723_v54  ;;  %v721_v60 = vmul.f32 %v681_v55, %v681_v55  ;;  %2143 = vmatmul.mubr.bf16.gmra.mxu1 %v853_v56  ;;  %v2344_v61 = vpop.eup %2343  ;;  %v818_v63 = vmul.f32 1.442695, %v758_v57  ;;  %2206 = vmatprep.subr.bf16.mxu0 %v2762_v23 }
 0x114   : > { %v2346_v0 = vpop.eup %2345  ;;  %2256 = vmatprep.subr.bf16.mxu1 %v2776_v25 }
 0x115   : > { %v824_v2 = vmul.f32 1.442695, %v761_v59  ;;  %v759_v3 = vmul.f32 %v2685_v1, %v721_v60  ;;  %2359 = vpow2.f32 %v818_v63  ;;  %2264 = vmatpush3.bf16.msra.mxu1 %v2776_v25 }
 0x116   : > { %v2348_v4 = vpop.eup %2347  ;;  %2257 = vmatprep.subr.bf16.mxu1 %v2783_v26 }
 0x117   : > { %v2350_v5 = vpop.eup %2349  ;;  %v820_v6 = vmul.f32 1.442695, %v759_v3  ;;  %v854_v7 = vpack.c.bf16 %v2348_v4, %v2344_v61  ;;  %2361 = vpow2.f32 %v824_v2 }
 0x118   : > { %v855_v8 = vpack.c.bf16 %v2346_v0, %v2350_v5 }
 0x119   : > { %2363 = vpow2.f32 %v820_v6  ;;  %2146 = vmatprep.mubr.bf16.mxu1 %v854_v7  ;;  %2265 = vmatpush3.bf16.msra.mxu1 %v2783_v26 }
 0x11a   : > { %2365 = vpow2.f32 %v822_v62  ;;  %v2352_v9 = vpop.eup %2351 }
 0x11b   : > { %2147 = vmatmul.mubr.bf16.gmra.mxu1 %v855_v8 }
 0x11c   : > { %v2354_v10 = vpop.eup %2353 }
 0x11e   : > { %v2356_v11 = vpop.eup %2355 }
 0x11f   : > { %v856_v12 = vpack.c.bf16 %v2356_v11, %v2352_v9  ;;  %v2358_v13 = vpop.eup %2357 }
 0x120   : > { %v857_v14 = vpack.c.bf16 %v2354_v10, %v2358_v13 }
 0x121   : > { %2150 = vmatprep.mubr.bf16.mxu1 %v856_v12 }
 0x122   : > { %v2360_v1 = vpop.eup %2359 }
 0x123   : > { %2151 = vmatmul.mubr.bf16.gmra.mxu1 %v857_v14 }
 0x124   : > { %v2362_v15 = vpop.eup %2361 }
 0x126   : > { %v2364_v16 = vpop.eup %2363 }
 0x127   : > { %v858_v17 = vpack.c.bf16 %v2364_v16, %v2360_v1  ;;  %v2366_v18 = vpop.eup %2365 }
 0x128   : > { %v859_v19 = vpack.c.bf16 %v2362_v15, %v2366_v18 }
 0x129   : > { %2154 = vmatprep.mubr.bf16.mxu1 %v858_v17 }
 0x12b   : > { %2155 = vmatmul.mubr.bf16.gmra.mxu1 %v859_v19 }
 0x1b3   : > { %v2128_v28 = vpop.f32.mrf.mxu1 }
 0x1b4   : > { %v957_v29 = vadd.f32 %v2128_v28, %v2791_v27 }
 0x1b5   : > { %v948_v31 = vpop.f32.mrf.mxu1 }
 0x1b6   : > { %v1077_v32 = vmul.f32 %v957_v29, %v957_v29  ;;  %v949_v33 = vadd.f32 %v2791_v27, %v948_v31 }
 0x1b7   : > { %v2129_v34 = vpop.f32.mrf.mxu1 }
 0x1b8   : > { %v1115_v35 = vmul.f32 %v2797_v30, %v1077_v32  ;;  %v1075_v36 = vmul.f32 %v949_v33, %v949_v33  ;;  %v960_v37 = vadd.f32 %v2129_v34, %v2791_v27 }
 0x1b9   : > { %v951_v38 = vpop.f32.mrf.mxu1 }
 0x1ba   : > { %v1078_v39 = vmul.f32 %v960_v37, %v960_v37  ;;  %v952_v40 = vadd.f32 %v2791_v27, %v951_v38  ;;  %v1113_v41 = vmul.f32 %v2797_v30, %v1075_v36  ;;  %v1149_v43 = vmul.f32 1.442695, %v1115_v35 }
 0x1bb   : > { %v2132_v42 = vpop.f32.mrf.mxu1 }
 0x1bc   : > { %v1116_v44 = vmul.f32 %v2797_v30, %v1078_v39  ;;  %v1076_v45 = vmul.f32 %v952_v40, %v952_v40  ;;  %v973_v46 = vadd.f32 %v2132_v42, %v2791_v27  ;;  %v1145_v51 = vmul.f32 1.442695, %v1113_v41 }
 0x1bd   : > { %v964_v47 = vpop.f32.mrf.mxu1  ;;  %2367 = vpow2.f32 %v1149_v43 }
 0x1be   : > { %v1151_v48 = vmul.f32 1.442695, %v1116_v44  ;;  %v1114_v49 = vmul.f32 %v2797_v30, %v1076_v45  ;;  %v965_v50 = vadd.f32 %v2791_v27, %v964_v47  ;;  %v1081_v52 = vmul.f32 %v973_v46, %v973_v46 }
 0x1bf   : > { %v2133_v53 = vpop.f32.mrf.mxu1 }
 0x1c0   : > { %v1147_v54 = vmul.f32 1.442695, %v1114_v49  ;;  %v1079_v55 = vmul.f32 %v965_v50, %v965_v50  ;;  %v976_v56 = vadd.f32 %v2133_v53, %v2791_v27  ;;  %2369 = vpow2.f32 %v1151_v48 }
 0x1c1   : > { %v1119_v57 = vmul.f32 %v2797_v30, %v1081_v52  ;;  %v967_v58 = vpop.f32.mrf.mxu1 }
 0x1c2   : > { %2371 = vpow2.f32 %v1147_v54  ;;  %v1082_v59 = vmul.f32 %v976_v56, %v976_v56  ;;  %v968_v60 = vadd.f32 %v2791_v27, %v967_v58  ;;  %v1117_v61 = vmul.f32 %v2797_v30, %v1079_v55 }
 0x1c3   : > { %2373 = vpow2.f32 %v1145_v51  ;;  %v2136_v63 = vpop.f32.mrf.mxu1  ;;  %v1157_v0 = vmul.f32 1.442695, %v1119_v57 }
 0x1c4   : > { %v1120_v2 = vmul.f32 %v2797_v30, %v1082_v59  ;;  %v1080_v3 = vmul.f32 %v968_v60, %v968_v60  ;;  %v989_v4 = vadd.f32 %v2136_v63, %v2791_v27  ;;  %v1153_v8 = vmul.f32 1.442695, %v1117_v61 }
 0x1c5   : > { %v980_v5 = vpop.f32.mrf.mxu1  ;;  %2375 = vpow2.f32 %v1157_v0 }
 0x1c6   : > { %v1159_v62 = vmul.f32 1.442695, %v1120_v2  ;;  %v1118_v6 = vmul.f32 %v2797_v30, %v1080_v3  ;;  %v1085_v7 = vmul.f32 %v989_v4, %v989_v4  ;;  %v981_v9 = vadd.f32 %v2791_v27, %v980_v5 }
 0x1c7   : > { %v2137_v10 = vpop.f32.mrf.mxu1 }
 0x1c8   : > { %v1155_v11 = vmul.f32 1.442695, %v1118_v6  ;;  %v1123_v12 = vmul.f32 %v2797_v30, %v1085_v7  ;;  %v992_v13 = vadd.f32 %v2137_v10, %v2791_v27  ;;  %2377 = vpow2.f32 %v1159_v62 }
 0x1c9   : > { %v1083_v14 = vmul.f32 %v981_v9, %v981_v9  ;;  %v983_v1 = vpop.f32.mrf.mxu1 }
 0x1ca   : > { %2379 = vpow2.f32 %v1155_v11  ;;  %v1086_v15 = vmul.f32 %v992_v13, %v992_v13  ;;  %v984_v16 = vadd.f32 %v2791_v27, %v983_v1  ;;  %v1165_v19 = vmul.f32 1.442695, %v1123_v12  ;;  %v2368_v28 = vpop.eup %2367 }
 0x1cb   : > { %2381 = vpow2.f32 %v1153_v8  ;;  %v1121_v17 = vmul.f32 %v2797_v30, %v1083_v14  ;;  %v2140_v18 = vpop.f32.mrf.mxu1 }
 0x1cc   : > { %v1124_v20 = vmul.f32 %v2797_v30, %v1086_v15  ;;  %v1084_v21 = vmul.f32 %v984_v16, %v984_v16  ;;  %v1005_v22 = vadd.f32 %v2140_v18, %v2791_v27  ;;  %2383 = vpow2.f32 %v1165_v19 }
 0x1cd   : > { %v996_v29 = vpop.f32.mrf.mxu1  ;;  %v2370_v31 = vpop.eup %2369  ;;  %v1161_v37 = vmul.f32 1.442695, %v1121_v17 }
 0x1ce   : > { %v1167_v32 = vmul.f32 1.442695, %v1124_v20  ;;  %v1122_v33 = vmul.f32 %v2797_v30, %v1084_v21  ;;  %v1089_v34 = vmul.f32 %v1005_v22, %v1005_v22  ;;  %v997_v35 = vadd.f32 %v2791_v27, %v996_v29 }
 0x1cf   : > { %v2372_v36 = vpop.eup %2371  ;;  %v2141_v38 = vpop.f32.mrf.mxu1  ;;  %v1228_v47 = vpack.c.bf16 %v2370_v31, %v2368_v28 }
 0x1d0   : > { %v2374_v39 = vpop.eup %2373  ;;  %v1163_v40 = vmul.f32 1.442695, %v1122_v33  ;;  %v1127_v41 = vmul.f32 %v2797_v30, %v1089_v34  ;;  %v1087_v42 = vmul.f32 %v997_v35, %v997_v35  ;;  %2385 = vpow2.f32 %v1167_v32 }
 0x1d1   : > { %v1008_v43 = vadd.f32 %v2141_v38, %v2791_v27  ;;  %v999_v44 = vpop.f32.mrf.mxu1  ;;  %v1227_v45 = vpack.c.bf16 %v2372_v36, %v2374_v39 }
 0x1d2   : > { %2387 = vpow2.f32 %v1163_v40  ;;  %v1000_v46 = vadd.f32 %v2791_v27, %v999_v44  ;;  %v1173_v48 = vmul.f32 1.442695, %v1127_v41  ;;  %v1125_v49 = vmul.f32 %v2797_v30, %v1087_v42  ;;  %v2376_v54 = vpop.eup %2375 }
 0x1d3   : > { %2389 = vpow2.f32 %v1161_v37  ;;  %v1090_v50 = vmul.f32 %v1008_v43, %v1008_v43  ;;  %2174 = vmatprep.mubr.bf16.mxu0 %v1227_v45  ;;  %v2144_v51 = vpop.f32.mrf.mxu1 }
 0x1d4   : > { %v1088_v52 = vmul.f32 %v1000_v46, %v1000_v46  ;;  %v1021_v53 = vadd.f32 %v2144_v51, %v2791_v27  ;;  %2175 = vmatmul.mubr.bf16.vlgmr.msra.gmra.mxu0 %v1228_v47  ;;  %2391 = vpow2.f32 %v1173_v48  ;;  %v1169_v61 = vmul.f32 1.442695, %v1125_v49 }
 0x1d5   : > { %v1128_v55 = vmul.f32 %v2797_v30, %v1090_v50  ;;  %v1012_v56 = vpop.f32.mrf.mxu1  ;;  %2207 = vmatpush3.bf16.msra.mxu0 %v2762_v23  ;;  %v2378_v57 = vpop.eup %2377 }
 0x1d6   : > { %v1126_v58 = vmul.f32 %v2797_v30, %v1088_v52  ;;  %v1013_v59 = vadd.f32 %v2791_v27, %v1012_v56  ;;  %2208 = vmatprep.subr.bf16.mxu0 %v2768_v24  ;;  %v1093_v4 = vmul.f32 %v1021_v53, %v1021_v53  ;;  %v1230_v9 = vpack.c.bf16 %v2378_v57, %v2376_v54 }
 0x1d7   : > { %v2380_v60 = vpop.eup %2379  ;;  %v1175_v63 = vmul.f32 1.442695, %v1128_v55  ;;  %v2145_v0 = vpop.f32.mrf.mxu1 }
 0x1d8   : > { %v2382_v2 = vpop.eup %2381  ;;  %v1171_v3 = vmul.f32 1.442695, %v1126_v58  ;;  %v1091_v5 = vmul.f32 %v1013_v59, %v1013_v59  ;;  %v1024_v62 = vadd.f32 %v2145_v0, %v2791_v27  ;;  %v1131_v12 = vmul.f32 %v2797_v30, %v1093_v4 }
 0x1d9   : > { %2393 = vpow2.f32 %v1175_v63  ;;  %v1015_v23 = vpop.f32.mrf.mxu1  ;;  %v1229_v6 = vpack.c.bf16 %v2380_v60, %v2382_v2  ;;  %2209 = vmatpush3.bf16.msra.mxu0 %v2768_v24  ;;  %v2384_v24 = vpop.eup %2383 }
 0x1da   : > { %2395 = vpow2.f32 %v1171_v3  ;;  %v1129_v7 = vmul.f32 %v2797_v30, %v1091_v5  ;;  %v1094_v8 = vmul.f32 %v1024_v62, %v1024_v62  ;;  %2210 = vmatprep.subr.bf16.mxu0 %v2776_v25  ;;  %v1016_v10 = vadd.f32 %v2791_v27, %v1015_v23 }
 0x1db   : > { %2397 = vpow2.f32 %v1169_v61  ;;  %2178 = vmatprep.mubr.bf16.mxu0 %v1229_v6  ;;  %v2148_v11 = vpop.f32.mrf.mxu1  ;;  %v1181_v31 = vmul.f32 1.442695, %v1131_v12 }
 0x1dc   : > { %v1132_v13 = vmul.f32 %v2797_v30, %v1094_v8  ;;  %v1037_v14 = vadd.f32 %v2148_v11, %v2791_v27  ;;  %2179 = vmatmul.mubr.bf16.gmra.mxu0 %v1230_v9  ;;  %v1177_v1 = vmul.f32 1.442695, %v1129_v7  ;;  %v1092_v15 = vmul.f32 %v1016_v10, %v1016_v10 }
 0x1dd   : > { %v1028_v16 = vpop.f32.mrf.mxu1  ;;  %2211 = vmatpush3.bf16.msra.mxu0 %v2776_v25  ;;  %v2386_v17 = vpop.eup %2385 }
 0x1de   : > { %v1183_v18 = vmul.f32 1.442695, %v1132_v13  ;;  %v1029_v19 = vadd.f32 %v2791_v27, %v1028_v16  ;;  %2212 = vmatprep.subr.bf16.mxu0 %v2783_v26  ;;  %v1130_v21 = vmul.f32 %v2797_v30, %v1092_v15  ;;  %v1097_v22 = vmul.f32 %v1037_v14, %v1037_v14 }
 0x1df   : > { %v2388_v20 = vpop.eup %2387  ;;  %v2149_v28 = vpop.f32.mrf.mxu1  ;;  %2399 = vpow2.f32 %v1177_v1  ;;  %v1232_v36 = vpack.c.bf16 %v2386_v17, %v2384_v24 }
 0x1e0   : > { %v2390_v29 = vpop.eup %2389  ;;  %v1095_v32 = vmul.f32 %v1029_v19, %v1029_v19  ;;  %v1040_v33 = vadd.f32 %v2149_v28, %v2791_v27  ;;  %v1179_v34 = vmul.f32 1.442695, %v1130_v21  ;;  %2401 = vpow2.f32 %v1183_v18 }
 0x1e1   : > { %v1031_v35 = vpop.f32.mrf.mxu1  ;;  %v1231_v25 = vpack.c.bf16 %v2388_v20, %v2390_v29  ;;  %2213 = vmatpush3.bf16.msra.mxu0 %v2783_v26  ;;  %v1135_v40 = vmul.f32 %v2797_v30, %v1097_v22  ;;  %v2392_v42 = vpop.eup %2391 }
 0x1e2   : > { %v1133_v37 = vmul.f32 %v2797_v30, %v1095_v32  ;;  %v1098_v38 = vmul.f32 %v1040_v33, %v1040_v33  ;;  %v1032_v39 = vadd.f32 %v2791_v27, %v1031_v35  ;;  %2403 = vpow2.f32 %v1179_v34 }
 0x1e3   : > { %2182 = vmatprep.mubr.bf16.mxu0 %v1231_v25  ;;  %v2152_v41 = vpop.f32.mrf.mxu1  ;;  %2405 = vpow2.f32 %v1181_v31  ;;  %v1189_v52 = vmul.f32 1.442695, %v1135_v40 }
 0x1e4   : > { %v1185_v43 = vmul.f32 1.442695, %v1133_v37  ;;  %v1136_v44 = vmul.f32 %v2797_v30, %v1098_v38  ;;  %v1096_v45 = vmul.f32 %v1032_v39, %v1032_v39  ;;  %2183 = vmatmul.mubr.bf16.gmra.mxu0 %v1232_v36  ;;  %v1053_v26 = vadd.f32 %v2152_v41, %v2791_v27 }
 0x1e5   : > { %v1044_v46 = vpop.f32.mrf.mxu1 }
 0x1e6   : > { %v2394_v47 = vpop.eup %2393  ;;  %v1191_v48 = vmul.f32 1.442695, %v1136_v44  ;;  %v1134_v49 = vmul.f32 %v2797_v30, %v1096_v45  ;;  %v1045_v50 = vadd.f32 %v2791_v27, %v1044_v46  ;;  %v1101_v53 = vmul.f32 %v1053_v26, %v1053_v26 }
 0x1e7   : > { %v2396_v51 = vpop.eup %2395  ;;  %v2153_v54 = vpop.f32.mrf.mxu1  ;;  %2407 = vpow2.f32 %v1185_v43  ;;  %v1234_v61 = vpack.c.bf16 %v2394_v47, %v2392_v42 }
 0x1e8   : > { %v2398_v55 = vpop.eup %2397  ;;  %v1187_v56 = vmul.f32 1.442695, %v1134_v49  ;;  %v1099_v57 = vmul.f32 %v1045_v50, %v1045_v50  ;;  %v1056_v58 = vadd.f32 %v2153_v54, %v2791_v27  ;;  %2409 = vpow2.f32 %v1191_v48  ;;  %v2300_v54 = vld [vmem:[%s3044_s10 + $0x10] sm:$0xff]  }
 0x1e9   : > { %v1047_v59 = vpop.f32.mrf.mxu1  ;;  %v1233_v60 = vpack.c.bf16 %v2396_v51, %v2398_v55  ;;  %v1139_v3 = vmul.f32 %v2797_v30, %v1101_v53  ;;  %v2299_v53 = vld [vmem:[%s3044_s10 + $0x18] sm:$0xff]   ;;  %v2301_v55 = vld [vmem:[%s3044_s10 + $0x8] sm:$0xff]  }
 0x1ea   : > { %2411 = vpow2.f32 %v1187_v56  ;;  %v1137_v63 = vmul.f32 %v2797_v30, %v1099_v57  ;;  %v1102_v0 = vmul.f32 %v1056_v58, %v1056_v58  ;;  %v1048_v2 = vadd.f32 %v2791_v27, %v1047_v59  ;;  %2258 = vmatprep.subr.bf16.mxu1 %v2299_v53  ;;  %2214 = vmatprep.subr.bf16.mxu0 %v2299_v53  ;;  %v2302_v56 = vld [vmem:[%s3044_s10] sm:$0xff]  }
 0x1eb   : > { %2413 = vpow2.f32 %v1189_v52  ;;  %2186 = vmatprep.mubr.bf16.mxu0 %v1233_v60  ;;  %v2156_v4 = vpop.f32.mrf.mxu1  ;;  %v1197_v12 = vmul.f32 1.442695, %v1139_v3  ;;  %2266 = vmatpush3.bf16.msra.mxu1 %v2299_v53  ;;  %v2884_v57 = vld [vmem:[%s3042_s8] ss:$0 sm:$0xff] }
 0x1ec   : > { %v1193_v5 = vmul.f32 1.442695, %v1137_v63  ;;  %v1140_v62 = vmul.f32 %v2797_v30, %v1102_v0  ;;  %v1100_v23 = vmul.f32 %v1048_v2, %v1048_v2  ;;  %v1069_v6 = vadd.f32 %v2156_v4, %v2791_v27  ;;  %2187 = vmatmul.mubr.bf16.gmra.mxu0 %v1234_v61  ;;  %v2400_v8 = vpop.eup %2399  ;;  %2259 = vmatprep.subr.bf16.mxu1 %v2300_v54  ;;  %v2890_v60 = vld [vmem:[%s3043_s9] ss:$0 sm:$0xff] }
 0x1ed   : > { %v1060_v7 = vpop.f32.mrf.mxu1  ;;  %v2402_v11 = vpop.eup %2401  ;;  %2215 = vmatpush3.bf16.msra.mxu0 %v2299_v53 }
 0x1ee   : > { %v1199_v9 = vmul.f32 1.442695, %v1140_v62  ;;  %v1138_v10 = vmul.f32 %v2797_v30, %v1100_v23  ;;  %v1061_v13 = vadd.f32 %v2791_v27, %v1060_v7  ;;  %2415 = vpow2.f32 %v1193_v5  ;;  %2216 = vmatprep.subr.bf16.mxu0 %v2300_v54 }
 0x1ef   : > { %v2157_v14 = vpop.f32.mrf.mxu1  ;;  %v2404_v24 = vpop.eup %2403  ;;  %v1105_v15 = vmul.f32 %v1069_v6, %v1069_v6  ;;  %2267 = vmatpush3.bf16.msra.mxu1 %v2300_v54 }
 0x1f0   : > { %v1195_v1 = vmul.f32 1.442695, %v1138_v10  ;;  %v1072_v16 = vadd.f32 %v2157_v14, %v2791_v27  ;;  %v2406_v17 = vpop.eup %2405  ;;  %2417 = vpow2.f32 %v1199_v9  ;;  %v1103_v18 = vmul.f32 %v1061_v13, %v1061_v13  ;;  %2260 = vmatprep.subr.bf16.mxu1 %v2301_v55 }
 0x1f1   : > { %v1063_v19 = vpop.f32.mrf.mxu1  ;;  %v1235_v20 = vpack.c.bf16 %v2404_v24, %v2400_v8  ;;  %v1236_v28 = vpack.c.bf16 %v2402_v11, %v2406_v17  ;;  %v1143_v31 = vmul.f32 %v2797_v30, %v1105_v15  ;;  %2217 = vmatpush3.bf16.msra.mxu0 %v2300_v54 }
 0x1f2   : > { %2419 = vpow2.f32 %v1195_v1  ;;  %v1106_v21 = vmul.f32 %v1072_v16, %v1072_v16  ;;  %v1064_v22 = vadd.f32 %v2791_v27, %v1063_v19  ;;  %v1141_v29 = vmul.f32 %v2797_v30, %v1103_v18  ;;  %2218 = vmatprep.subr.bf16.mxu0 %v2301_v55 }
 0x1f3   : > { %2190 = vmatprep.mubr.bf16.mxu0 %v1235_v20  ;;  %2421 = vpow2.f32 %v1197_v12  ;;  %v1205_v27 = vmul.f32 1.442695, %v1143_v31  ;;  %2268 = vmatpush3.bf16.msra.mxu1 %v2301_v55 }
 0x1f4   : > { %v1144_v32 = vmul.f32 %v2797_v30, %v1106_v21  ;;  %v1104_v33 = vmul.f32 %v1064_v22, %v1064_v22  ;;  %2191 = vmatmul.mubr.bf16.gmra.mxu0 %v1236_v28  ;;  %v2408_v34 = vpop.eup %2407  ;;  %v1201_v35 = vmul.f32 1.442695, %v1141_v29  ;;  %2261 = vmatprep.subr.bf16.mxu1 %v2302_v56 }
 0x1f5   : > { %v2410_v25 = vpop.eup %2409  ;;  %2219 = vmatpush3.bf16.msra.mxu0 %v2301_v55 }
 0x1f6   : > { %v1207_v36 = vmul.f32 1.442695, %v1144_v32  ;;  %v1142_v37 = vmul.f32 %v2797_v30, %v1104_v33  ;;  %2423 = vpow2.f32 %v1201_v35  ;;  %2220 = vmatprep.subr.bf16.mxu0 %v2302_v56 }
 0x1f7   : > { %v2412_v38 = vpop.eup %2411  ;;  %2269 = vmatpush3.bf16.msra.mxu1 %v2302_v56 }
 0x1f8   : > { %v2414_v39 = vpop.eup %2413  ;;  %v1203_v40 = vmul.f32 1.442695, %v1142_v37  ;;  %v1237_v41 = vpack.c.bf16 %v2412_v38, %v2408_v34  ;;  %2425 = vpow2.f32 %v1207_v36 }
 0x1f9   : > { %v1238_v42 = vpack.c.bf16 %v2410_v25, %v2414_v39  ;;  %2221 = vmatpush3.bf16.msra.mxu0 %v2302_v56 }
 0x1fa   : > { %2427 = vpow2.f32 %v1203_v40  ;;  %2194 = vmatprep.mubr.bf16.mxu0 %v1237_v41 }
 0x1fb   : > { %2429 = vpow2.f32 %v1205_v27  ;;  %v2416_v43 = vpop.eup %2415 }
 0x1fc   : > { %2195 = vmatmul.mubr.bf16.gmra.mxu0 %v1238_v42 }
 0x1fd   : > { %v2418_v44 = vpop.eup %2417 }
 0x1ff   : > { %v2420_v45 = vpop.eup %2419 }
 0x200   : > { %v1239_v26 = vpack.c.bf16 %v2420_v45, %v2416_v43  ;;  %v2422_v46 = vpop.eup %2421 }
 0x201   : > { %v1240_v47 = vpack.c.bf16 %v2418_v44, %v2422_v46 }
 0x202   : > { %2198 = vmatprep.mubr.bf16.mxu0 %v1239_v26 }
 0x203   : > { %v2424_v30 = vpop.eup %2423 }
 0x204   : > { %2199 = vmatmul.mubr.bf16.gmra.mxu0 %v1240_v47 }
 0x205   : > { %v2426_v48 = vpop.eup %2425 }
 0x207   : > { %v2428_v49 = vpop.eup %2427 }
 0x208   : > { %v1241_v50 = vpack.c.bf16 %v2428_v49, %v2424_v30  ;;  %v2430_v51 = vpop.eup %2429 }
 0x209   : > { %v1242_v52 = vpack.c.bf16 %v2426_v48, %v2430_v51 }
 0x20a   : > { %2202 = vmatprep.mubr.bf16.mxu0 %v1241_v50 }
 0x20c   : > { %2203 = vmatmul.mubr.bf16.gmra.mxu0 %v1242_v52 }
 0x294   : > { %v2176_v58 = vpop.f32.mrf.mxu0 }
 0x295   : > { %v1340_v59 = vadd.f32 %v2176_v58, %v2884_v57 }
 0x296   : > { %v1331_v61 = vpop.f32.mrf.mxu0 }
 0x297   : > { %v1460_v63 = vmul.f32 %v1340_v59, %v1340_v59  ;;  %v1332_v0 = vadd.f32 %v2884_v57, %v1331_v61 }
 0x298   : > { %v2177_v2 = vpop.f32.mrf.mxu0 }
 0x299   : > { %v1498_v3 = vmul.f32 %v2890_v60, %v1460_v63  ;;  %v1458_v4 = vmul.f32 %v1332_v0, %v1332_v0  ;;  %v1343_v5 = vadd.f32 %v2177_v2, %v2884_v57 }
 0x29a   : > { %v1334_v62 = vpop.f32.mrf.mxu0 }
 0x29b   : > { %v1461_v23 = vmul.f32 %v1343_v5, %v1343_v5  ;;  %v1335_v6 = vadd.f32 %v2884_v57, %v1334_v62  ;;  %v1496_v7 = vmul.f32 %v2890_v60, %v1458_v4  ;;  %v1532_v9 = vmul.f32 1.442695, %v1498_v3 }
 0x29c   : > { %v2180_v8 = vpop.f32.mrf.mxu0 }
 0x29d   : > { %v1499_v10 = vmul.f32 %v2890_v60, %v1461_v23  ;;  %v1459_v11 = vmul.f32 %v1335_v6, %v1335_v6  ;;  %v1356_v12 = vadd.f32 %v2180_v8, %v2884_v57  ;;  %v1528_v15 = vmul.f32 1.442695, %v1496_v7 }
 0x29e   : > { %v1347_v13 = vpop.f32.mrf.mxu0  ;;  %2431 = vpow2.f32 %v1532_v9 }
 0x29f   : > { %v1534_v14 = vmul.f32 1.442695, %v1499_v10  ;;  %v1497_v24 = vmul.f32 %v2890_v60, %v1459_v11  ;;  %v1348_v1 = vadd.f32 %v2884_v57, %v1347_v13  ;;  %v1464_v16 = vmul.f32 %v1356_v12, %v1356_v12 }
 0x2a0   : > { %v2181_v17 = vpop.f32.mrf.mxu0 }
 0x2a1   : > { %v1530_v18 = vmul.f32 1.442695, %v1497_v24  ;;  %v1462_v19 = vmul.f32 %v1348_v1, %v1348_v1  ;;  %v1359_v20 = vadd.f32 %v2181_v17, %v2884_v57  ;;  %2433 = vpow2.f32 %v1534_v14 }
 0x2a2   : > { %v1502_v21 = vmul.f32 %v2890_v60, %v1464_v16  ;;  %v1350_v22 = vpop.f32.mrf.mxu0 }
 0x2a3   : > { %2435 = vpow2.f32 %v1530_v18  ;;  %v1465_v28 = vmul.f32 %v1359_v20, %v1359_v20  ;;  %v1351_v29 = vadd.f32 %v2884_v57, %v1350_v22  ;;  %v1500_v31 = vmul.f32 %v2890_v60, %v1462_v19 }
 0x2a4   : > { %2437 = vpow2.f32 %v1528_v15  ;;  %v2184_v32 = vpop.f32.mrf.mxu0  ;;  %v1540_v33 = vmul.f32 1.442695, %v1502_v21 }
 0x2a5   : > { %v1503_v34 = vmul.f32 %v2890_v60, %v1465_v28  ;;  %v1463_v35 = vmul.f32 %v1351_v29, %v1351_v29  ;;  %v1372_v25 = vadd.f32 %v2184_v32, %v2884_v57  ;;  %v1536_v27 = vmul.f32 1.442695, %v1500_v31 }
 0x2a6   : > { %v1363_v36 = vpop.f32.mrf.mxu0  ;;  %2439 = vpow2.f32 %v1540_v33 }
 0x2a7   : > { %v1542_v37 = vmul.f32 1.442695, %v1503_v34  ;;  %v1501_v38 = vmul.f32 %v2890_v60, %v1463_v35  ;;  %v1468_v39 = vmul.f32 %v1372_v25, %v1372_v25  ;;  %v1364_v40 = vadd.f32 %v2884_v57, %v1363_v36 }
 0x2a8   : > { %v2185_v41 = vpop.f32.mrf.mxu0 }
 0x2a9   : > { %v1538_v42 = vmul.f32 1.442695, %v1501_v38  ;;  %v1506_v43 = vmul.f32 %v2890_v60, %v1468_v39  ;;  %v1375_v44 = vadd.f32 %v2185_v41, %v2884_v57  ;;  %2441 = vpow2.f32 %v1542_v37 }
 0x2aa   : > { %v1466_v45 = vmul.f32 %v1364_v40, %v1364_v40  ;;  %v1366_v26 = vpop.f32.mrf.mxu0 }
 0x2ab   : > { %2443 = vpow2.f32 %v1538_v42  ;;  %v1469_v46 = vmul.f32 %v1375_v44, %v1375_v44  ;;  %v1367_v47 = vadd.f32 %v2884_v57, %v1366_v26  ;;  %v1548_v49 = vmul.f32 1.442695, %v1506_v43  ;;  %v2432_v53 = vpop.eup %2431 }
 0x2ac   : > { %2445 = vpow2.f32 %v1536_v27  ;;  %v1504_v30 = vmul.f32 %v2890_v60, %v1466_v45  ;;  %v2188_v48 = vpop.f32.mrf.mxu0 }
 0x2ad   : > { %v1507_v50 = vmul.f32 %v2890_v60, %v1469_v46  ;;  %v1467_v51 = vmul.f32 %v1367_v47, %v1367_v47  ;;  %v1388_v52 = vadd.f32 %v2188_v48, %v2884_v57  ;;  %2447 = vpow2.f32 %v1548_v49 }
 0x2ae   : > { %v1379_v54 = vpop.f32.mrf.mxu0  ;;  %v2434_v55 = vpop.eup %2433  ;;  %v1544_v0 = vmul.f32 1.442695, %v1504_v30 }
 0x2af   : > { %v1550_v56 = vmul.f32 1.442695, %v1507_v50  ;;  %v1505_v58 = vmul.f32 %v2890_v60, %v1467_v51  ;;  %v1472_v59 = vmul.f32 %v1388_v52, %v1388_v52  ;;  %v1380_v61 = vadd.f32 %v2884_v57, %v1379_v54 }
 0x2b0   : > { %v2436_v63 = vpop.eup %2435  ;;  %v2189_v2 = vpop.f32.mrf.mxu0  ;;  %v1610_v9 = vpack.c.bf16 %v2434_v55, %v2432_v53 }
 0x2b1   : > { %v2438_v3 = vpop.eup %2437  ;;  %v1546_v4 = vmul.f32 1.442695, %v1505_v58  ;;  %v1510_v5 = vmul.f32 %v2890_v60, %v1472_v59  ;;  %v1470_v62 = vmul.f32 %v1380_v61, %v1380_v61  ;;  %2449 = vpow2.f32 %v1550_v56 }
 0x2b2   : > { %v1391_v23 = vadd.f32 %v2189_v2, %v2884_v57  ;;  %v1382_v6 = vpop.f32.mrf.mxu0  ;;  %v1609_v7 = vpack.c.bf16 %v2436_v63, %v2438_v3 }
 0x2b3   : > { %2451 = vpow2.f32 %v1546_v4  ;;  %v1383_v8 = vadd.f32 %v2884_v57, %v1382_v6  ;;  %v1556_v10 = vmul.f32 1.442695, %v1510_v5  ;;  %v1508_v11 = vmul.f32 %v2890_v60, %v1470_v62  ;;  %v2440_v1 = vpop.eup %2439 }
 0x2b4   : > { %2453 = vpow2.f32 %v1544_v0  ;;  %v1473_v12 = vmul.f32 %v1391_v23, %v1391_v23  ;;  %2222 = vmatprep.mubr.bf16.mxu0 %v1609_v7  ;;  %v2192_v13 = vpop.f32.mrf.mxu0 }
 0x2b5   : > { %v1471_v14 = vmul.f32 %v1383_v8, %v1383_v8  ;;  %v1404_v24 = vadd.f32 %v2192_v13, %v2884_v57  ;;  %2223 = vmatmul.mubr.bf16.vlgmr.msra.gmra.mxu0 %v1610_v9  ;;  %2455 = vpow2.f32 %v1556_v10  ;;  %v1552_v21 = vmul.f32 1.442695, %v1508_v11 }
 0x2b6   : > { %v1511_v15 = vmul.f32 %v2890_v60, %v1473_v12  ;;  %v1395_v16 = vpop.f32.mrf.mxu0  ;;  %v2442_v17 = vpop.eup %2441 }
 0x2b7   : > { %v1509_v18 = vmul.f32 %v2890_v60, %v1471_v14  ;;  %v1396_v19 = vadd.f32 %v2884_v57, %v1395_v16  ;;  %v1476_v32 = vmul.f32 %v1404_v24, %v1404_v24  ;;  %v1612_v38 = vpack.c.bf16 %v2442_v17, %v2440_v1 }
 0x2b8   : > { %v2444_v20 = vpop.eup %2443  ;;  %v1558_v22 = vmul.f32 1.442695, %v1511_v15  ;;  %v2193_v28 = vpop.f32.mrf.mxu0 }
 0x2b9   : > { %v2446_v29 = vpop.eup %2445  ;;  %v1554_v31 = vmul.f32 1.442695, %v1509_v18  ;;  %v1474_v33 = vmul.f32 %v1396_v19, %v1396_v19  ;;  %v1407_v34 = vadd.f32 %v2193_v28, %v2884_v57  ;;  %v1514_v40 = vmul.f32 %v2890_v60, %v1476_v32 }
 0x2ba   : > { %2457 = vpow2.f32 %v1558_v22  ;;  %v1398_v35 = vpop.f32.mrf.mxu0  ;;  %v1611_v25 = vpack.c.bf16 %v2444_v20, %v2446_v29  ;;  %v2448_v43 = vpop.eup %2447 }
 0x2bb   : > { %2459 = vpow2.f32 %v1554_v31  ;;  %v1512_v36 = vmul.f32 %v2890_v60, %v1474_v33  ;;  %v1477_v37 = vmul.f32 %v1407_v34, %v1407_v34  ;;  %v1399_v39 = vadd.f32 %v2884_v57, %v1398_v35 }
 0x2bc   : > { %2461 = vpow2.f32 %v1552_v21  ;;  %2226 = vmatprep.mubr.bf16.mxu1 %v1611_v25  ;;  %v2196_v27 = vpop.f32.mrf.mxu0  ;;  %v1564_v53 = vmul.f32 1.442695, %v1514_v40 }
 0x2bd   : > { %v1515_v41 = vmul.f32 %v2890_v60, %v1477_v37  ;;  %v1420_v42 = vadd.f32 %v2196_v27, %v2884_v57  ;;  %2227 = vmatmul.mubr.bf16.vlgmr.msra.gmra.mxu1 %v1612_v38  ;;  %v1560_v44 = vmul.f32 1.442695, %v1512_v36  ;;  %v1475_v45 = vmul.f32 %v1399_v39, %v1399_v39 }
 0x2be   : > { %v1411_v26 = vpop.f32.mrf.mxu0  ;;  %v2450_v46 = vpop.eup %2449 }
 0x2bf   : > { %v1566_v47 = vmul.f32 1.442695, %v1515_v41  ;;  %v1412_v30 = vadd.f32 %v2884_v57, %v1411_v26  ;;  %v1513_v49 = vmul.f32 %v2890_v60, %v1475_v45  ;;  %v1480_v50 = vmul.f32 %v1420_v42, %v1420_v42 }
 0x2c0   : > { %v2452_v48 = vpop.eup %2451  ;;  %v2197_v51 = vpop.f32.mrf.mxu0  ;;  %2463 = vpow2.f32 %v1560_v44  ;;  %v1614_v61 = vpack.c.bf16 %v2450_v46, %v2448_v43 }
 0x2c1   : > { %v2454_v52 = vpop.eup %2453  ;;  %v1478_v54 = vmul.f32 %v1412_v30, %v1412_v30  ;;  %v1423_v55 = vadd.f32 %v2197_v51, %v2884_v57  ;;  %v1562_v56 = vmul.f32 1.442695, %v1513_v49  ;;  %2465 = vpow2.f32 %v1566_v47 }
 0x2c2   : > { %v1414_v58 = vpop.f32.mrf.mxu0  ;;  %v1613_v59 = vpack.c.bf16 %v2452_v48, %v2454_v52  ;;  %v1518_v3 = vmul.f32 %v2890_v60, %v1480_v50  ;;  %v2456_v5 = vpop.eup %2455 }
 0x2c3   : > { %v1516_v63 = vmul.f32 %v2890_v60, %v1478_v54  ;;  %v1481_v0 = vmul.f32 %v1423_v55, %v1423_v55  ;;  %v1415_v2 = vadd.f32 %v2884_v57, %v1414_v58  ;;  %2467 = vpow2.f32 %v1562_v56 }
 0x2c4   : > { %2230 = vmatprep.mubr.bf16.mxu1 %v1613_v59  ;;  %v2200_v4 = vpop.f32.mrf.mxu0  ;;  %2469 = vpow2.f32 %v1564_v53  ;;  %v1572_v14 = vmul.f32 1.442695, %v1518_v3 }
 0x2c5   : > { %v1568_v62 = vmul.f32 1.442695, %v1516_v63  ;;  %v1519_v23 = vmul.f32 %v2890_v60, %v1481_v0  ;;  %v1479_v6 = vmul.f32 %v1415_v2, %v1415_v2  ;;  %2231 = vmatmul.mubr.bf16.gmra.mxu1 %v1614_v61  ;;  %v1436_v7 = vadd.f32 %v2200_v4, %v2884_v57 }
 0x2c6   : > { %v1427_v8 = vpop.f32.mrf.mxu0 }
 0x2c7   : > { %v2458_v9 = vpop.eup %2457  ;;  %v1574_v10 = vmul.f32 1.442695, %v1519_v23  ;;  %v1517_v11 = vmul.f32 %v2890_v60, %v1479_v6  ;;  %v1428_v12 = vadd.f32 %v2884_v57, %v1427_v8  ;;  %v1484_v24 = vmul.f32 %v1436_v7, %v1436_v7 }
 0x2c8   : > { %v2460_v13 = vpop.eup %2459  ;;  %v2201_v1 = vpop.f32.mrf.mxu0  ;;  %2471 = vpow2.f32 %v1568_v62  ;;  %v1616_v21 = vpack.c.bf16 %v2458_v9, %v2456_v5 }
 0x2c9   : > { %v2462_v15 = vpop.eup %2461  ;;  %v1570_v16 = vmul.f32 1.442695, %v1517_v11  ;;  %v1482_v17 = vmul.f32 %v1428_v12, %v1428_v12  ;;  %v1439_v18 = vadd.f32 %v2201_v1, %v2884_v57  ;;  %2473 = vpow2.f32 %v1574_v10 }
 0x2ca   : > { %v1430_v19 = vpop.f32.mrf.mxu0  ;;  %v1615_v20 = vpack.c.bf16 %v2460_v13, %v2462_v15  ;;  %v1522_v31 = vmul.f32 %v2890_v60, %v1484_v24  ;;  %v2958_v24 = vld [vmem:[%s3045_s11] ss:$0 sm:$0xff] }
 0x2cb   : > { %2475 = vpow2.f32 %v1570_v16  ;;  %v1520_v22 = vmul.f32 %v2890_v60, %v1482_v17  ;;  %v1485_v28 = vmul.f32 %v1439_v18, %v1439_v18  ;;  %v1431_v29 = vadd.f32 %v2884_v57, %v1430_v19 }
 0x2cc   : > { %2477 = vpow2.f32 %v1572_v14  ;;  %2234 = vmatprep.mubr.bf16.mxu1 %v1615_v20  ;;  %v2204_v32 = vpop.f32.mrf.mxu0  ;;  %v1580_v40 = vmul.f32 1.442695, %v1522_v31 }
 0x2cd   : > { %v1576_v33 = vmul.f32 1.442695, %v1520_v22  ;;  %v1523_v34 = vmul.f32 %v2890_v60, %v1485_v28  ;;  %v1483_v35 = vmul.f32 %v1431_v29, %v1431_v29  ;;  %v1452_v25 = vadd.f32 %v2204_v32, %v2884_v57  ;;  %2235 = vmatmul.mubr.bf16.gmra.mxu1 %v1616_v21  ;;  %v2464_v37 = vpop.eup %2463 }
 0x2ce   : > { %v1443_v36 = vpop.f32.mrf.mxu0  ;;  %v2466_v27 = vpop.eup %2465 }
 0x2cf   : > { %v1582_v38 = vmul.f32 1.442695, %v1523_v34  ;;  %v1521_v39 = vmul.f32 %v2890_v60, %v1483_v35  ;;  %v1444_v41 = vadd.f32 %v2884_v57, %v1443_v36  ;;  %2479 = vpow2.f32 %v1576_v33 }
 0x2d0   : > { %v2205_v42 = vpop.f32.mrf.mxu0  ;;  %v2468_v43 = vpop.eup %2467  ;;  %v1488_v45 = vmul.f32 %v1452_v25, %v1452_v25 }
 0x2d1   : > { %v1578_v44 = vmul.f32 1.442695, %v1521_v39  ;;  %v1455_v26 = vadd.f32 %v2205_v42, %v2884_v57  ;;  %v2470_v46 = vpop.eup %2469  ;;  %2481 = vpow2.f32 %v1582_v38  ;;  %v1486_v47 = vmul.f32 %v1444_v41, %v1444_v41 }
 0x2d2   : > { %v1446_v30 = vpop.f32.mrf.mxu0  ;;  %v1617_v48 = vpack.c.bf16 %v2468_v43, %v2464_v37  ;;  %v1618_v51 = vpack.c.bf16 %v2466_v27, %v2470_v46  ;;  %v1526_v53 = vmul.f32 %v2890_v60, %v1488_v45 }
 0x2d3   : > { %2483 = vpow2.f32 %v1578_v44  ;;  %v1489_v49 = vmul.f32 %v1455_v26, %v1455_v26  ;;  %v1447_v50 = vadd.f32 %v2884_v57, %v1446_v30  ;;  %v1524_v52 = vmul.f32 %v2890_v60, %v1486_v47 }
 0x2d4   : > { %2238 = vmatprep.mubr.bf16.mxu1 %v1617_v48  ;;  %2485 = vpow2.f32 %v1580_v40  ;;  %v1588_v57 = vmul.f32 1.442695, %v1526_v53 }
 0x2d5   : > { %v1527_v54 = vmul.f32 %v2890_v60, %v1489_v49  ;;  %v1487_v55 = vmul.f32 %v1447_v50, %v1447_v50  ;;  %2239 = vmatmul.mubr.bf16.gmra.mxu1 %v1618_v51  ;;  %v2472_v56 = vpop.eup %2471  ;;  %v1584_v58 = vmul.f32 1.442695, %v1524_v52 }
 0x2d6   : > { %v2474_v59 = vpop.eup %2473 }
 0x2d7   : > { %v1590_v61 = vmul.f32 1.442695, %v1527_v54  ;;  %v1525_v63 = vmul.f32 %v2890_v60, %v1487_v55  ;;  %2487 = vpow2.f32 %v1584_v58 }
 0x2d8   : > { %v2476_v0 = vpop.eup %2475 }
 0x2d9   : > { %v2478_v2 = vpop.eup %2477  ;;  %v1586_v3 = vmul.f32 1.442695, %v1525_v63  ;;  %v1619_v4 = vpack.c.bf16 %v2476_v0, %v2472_v56  ;;  %2489 = vpow2.f32 %v1590_v61 }
 0x2da   : > { %v1620_v5 = vpack.c.bf16 %v2474_v59, %v2478_v2 }
 0x2db   : > { %2491 = vpow2.f32 %v1586_v3  ;;  %2242 = vmatprep.mubr.bf16.mxu1 %v1619_v4 }
 0x2dc   : > { %2493 = vpow2.f32 %v1588_v57  ;;  %v2480_v62 = vpop.eup %2479 }
 0x2dd   : > { %2243 = vmatmul.mubr.bf16.gmra.mxu1 %v1620_v5 }
 0x2de   : > { %v2482_v23 = vpop.eup %2481 }
 0x2e0   : > { %v2484_v6 = vpop.eup %2483 }
 0x2e1   : > { %v1621_v7 = vpack.c.bf16 %v2484_v6, %v2480_v62  ;;  %v2486_v8 = vpop.eup %2485 }
 0x2e2   : > { %v1622_v60 = vpack.c.bf16 %v2482_v23, %v2486_v8 }
 0x2e3   : > { %2246 = vmatprep.mubr.bf16.mxu1 %v1621_v7 }
 0x2e4   : > { %v2488_v9 = vpop.eup %2487 }
 0x2e5   : > { %2247 = vmatmul.mubr.bf16.gmra.mxu1 %v1622_v60 }
 0x2e6   : > { %v2490_v10 = vpop.eup %2489 }
 0x2e8   : > { %v2492_v11 = vpop.eup %2491 }
 0x2e9   : > { %v1623_v12 = vpack.c.bf16 %v2492_v11, %v2488_v9  ;;  %v2494_v13 = vpop.eup %2493 }
 0x2ea   : > { %v1624_v14 = vpack.c.bf16 %v2490_v10, %v2494_v13 }
 0x2eb   : > { %2250 = vmatprep.mubr.bf16.mxu1 %v1623_v12 }
 0x2ed   : > { %2251 = vmatmul.mubr.bf16.gmra.mxu1 %v1624_v14 }
 0x375   : > { %v2224_v1 = vpop.f32.mrf.mxu0 }
 0x376   : > { %v1722_v15 = vadd.f32 %v2224_v1, %v2958_v24 }
 0x377   : > { %v1713_v16 = vpop.f32.mrf.mxu0 }
 0x378   : > { %1842 = vst [vmem:[%s2965_s16 + $0x10] sm:$0xff] %v1722_v15  ;;  %v1714_v17 = vadd.f32 %v2958_v24, %v1713_v16 }
 0x379   : > { %v2225_v18 = vpop.f32.mrf.mxu0 }
 0x37a   : > { %1840 = vst [vmem:[%s2965_s16] sm:$0xff] %v1714_v17  ;;  %v1725_v19 = vadd.f32 %v2225_v18, %v2958_v24 }
 0x37b   : > { %v1716_v20 = vpop.f32.mrf.mxu0 }
 0x37c   : > { %1843 = vst [vmem:[%s2965_s16 + $0x18] sm:$0xff] %v1725_v19  ;;  %v1717_v21 = vadd.f32 %v2958_v24, %v1716_v20 }
 0x37d   : > { %v2228_v22 = vpop.f32.mrf.mxu1 }
 0x37e   : > { %1841 = vst [vmem:[%s2965_s16 + $0x8] sm:$0xff] %v1717_v21  ;;  %v1738_v28 = vadd.f32 %v2228_v22, %v2958_v24 }
 0x37f   : > { %v1729_v29 = vpop.f32.mrf.mxu1 }
 0x380   : > { %1846 = vst [vmem:[%s2965_s16 + $0x30] sm:$0xff] %v1738_v28  ;;  %v1730_v31 = vadd.f32 %v2958_v24, %v1729_v29 }
 0x381   : > { %v2229_v32 = vpop.f32.mrf.mxu1 }
 0x382   : > { %1844 = vst [vmem:[%s2965_s16 + $0x20] sm:$0xff] %v1730_v31  ;;  %v1741_v33 = vadd.f32 %v2229_v32, %v2958_v24 }
 0x383   : > { %v1732_v34 = vpop.f32.mrf.mxu1 }
 0x384   : > { %1847 = vst [vmem:[%s2965_s16 + $0x38] sm:$0xff] %v1741_v33  ;;  %v1733_v35 = vadd.f32 %v2958_v24, %v1732_v34 }
 0x385   : > { %v2232_v25 = vpop.f32.mrf.mxu1 }
 0x386   : > { %1845 = vst [vmem:[%s2965_s16 + $0x28] sm:$0xff] %v1733_v35  ;;  %v1754_v36 = vadd.f32 %v2232_v25, %v2958_v24 }
 0x387   : > { %v1745_v37 = vpop.f32.mrf.mxu1 }
 0x388   : > { %1850 = vst [vmem:[%s2965_s16 + $0x50] sm:$0xff] %v1754_v36  ;;  %v1746_v38 = vadd.f32 %v2958_v24, %v1745_v37 }
 0x389   : > { %v2233_v39 = vpop.f32.mrf.mxu1 }
 0x38a   : > { %1848 = vst [vmem:[%s2965_s16 + $0x40] sm:$0xff] %v1746_v38  ;;  %v1757_v27 = vadd.f32 %v2233_v39, %v2958_v24 }
 0x38b   : > { %v1748_v40 = vpop.f32.mrf.mxu1 }
 0x38c   : > { %1851 = vst [vmem:[%s2965_s16 + $0x58] sm:$0xff] %v1757_v27  ;;  %v1749_v41 = vadd.f32 %v2958_v24, %v1748_v40 }
 0x38d   : > { %v2236_v42 = vpop.f32.mrf.mxu1 }
 0x38e   : > { %1849 = vst [vmem:[%s2965_s16 + $0x48] sm:$0xff] %v1749_v41  ;;  %v1770_v43 = vadd.f32 %v2236_v42, %v2958_v24 }
 0x38f   : > { %v1761_v44 = vpop.f32.mrf.mxu1 }
 0x390   : > { %1854 = vst [vmem:[%s2965_s16 + $0x70] sm:$0xff] %v1770_v43  ;;  %v1762_v45 = vadd.f32 %v2958_v24, %v1761_v44 }
 0x391   : > { %v2237_v26 = vpop.f32.mrf.mxu1 }
 0x392   : > { %1852 = vst [vmem:[%s2965_s16 + $0x60] sm:$0xff] %v1762_v45  ;;  %v1773_v46 = vadd.f32 %v2237_v26, %v2958_v24 }
 0x393   : > { %v1764_v47 = vpop.f32.mrf.mxu1 }
 0x394   : > { %1855 = vst [vmem:[%s2965_s16 + $0x78] sm:$0xff] %v1773_v46  ;;  %v1765_v30 = vadd.f32 %v2958_v24, %v1764_v47 }
 0x395   : > { %v2240_v48 = vpop.f32.mrf.mxu1 }
 0x396   : > { %1853 = vst [vmem:[%s2965_s16 + $0x68] sm:$0xff] %v1765_v30  ;;  %v1786_v49 = vadd.f32 %v2240_v48, %v2958_v24 }
 0x397   : > { %v1777_v50 = vpop.f32.mrf.mxu1 }
 0x398   : > { %1858 = vst [vmem:[%s2965_s16 + $0x90] sm:$0xff] %v1786_v49  ;;  %v1778_v51 = vadd.f32 %v2958_v24, %v1777_v50 }
 0x399   : > { %v2241_v52 = vpop.f32.mrf.mxu1 }
 0x39a   : > { %1856 = vst [vmem:[%s2965_s16 + $0x80] sm:$0xff] %v1778_v51  ;;  %v1789_v53 = vadd.f32 %v2241_v52, %v2958_v24 }
 0x39b   : > { %v1780_v54 = vpop.f32.mrf.mxu1 }
 0x39c   : > { %1859 = vst [vmem:[%s2965_s16 + $0x98] sm:$0xff] %v1789_v53  ;;  %v1781_v55 = vadd.f32 %v2958_v24, %v1780_v54 }
 0x39d   : > { %v2244_v56 = vpop.f32.mrf.mxu1 }
 0x39e   : > { %1857 = vst [vmem:[%s2965_s16 + $0x88] sm:$0xff] %v1781_v55  ;;  %v1802_v58 = vadd.f32 %v2244_v56, %v2958_v24 }
 0x39f   : > { %v1793_v59 = vpop.f32.mrf.mxu1 }
 0x3a0   : > { %1862 = vst [vmem:[%s2965_s16 + $0xb0] sm:$0xff] %v1802_v58  ;;  %v1794_v61 = vadd.f32 %v2958_v24, %v1793_v59 }
 0x3a1   : > { %v2245_v63 = vpop.f32.mrf.mxu1 }
 0x3a2   : > { %1860 = vst [vmem:[%s2965_s16 + $0xa0] sm:$0xff] %v1794_v61  ;;  %v1805_v0 = vadd.f32 %v2245_v63, %v2958_v24 }
 0x3a3   : > { %v1796_v2 = vpop.f32.mrf.mxu1 }
 0x3a4   : > { %1863 = vst [vmem:[%s2965_s16 + $0xb8] sm:$0xff] %v1805_v0  ;;  %v1797_v57 = vadd.f32 %v2958_v24, %v1796_v2 }
 0x3a5   : > { %v2248_v3 = vpop.f32.mrf.mxu1 }
 0x3a6   : > { %1861 = vst [vmem:[%s2965_s16 + $0xa8] sm:$0xff] %v1797_v57  ;;  %v1818_v4 = vadd.f32 %v2248_v3, %v2958_v24 }
 0x3a7   : > { %v1809_v5 = vpop.f32.mrf.mxu1 }
 0x3a8   : > { %1866 = vst [vmem:[%s2965_s16 + $0xd0] sm:$0xff] %v1818_v4  ;;  %v1810_v62 = vadd.f32 %v2958_v24, %v1809_v5 }
 0x3a9   : > { %v2249_v23 = vpop.f32.mrf.mxu1 }
 0x3aa   : > { %1864 = vst [vmem:[%s2965_s16 + $0xc0] sm:$0xff] %v1810_v62  ;;  %v1821_v6 = vadd.f32 %v2249_v23, %v2958_v24 }
 0x3ab   : > { %v1812_v7 = vpop.f32.mrf.mxu1 }
 0x3ac   : > { %1867 = vst [vmem:[%s2965_s16 + $0xd8] sm:$0xff] %v1821_v6  ;;  %v1813_v8 = vadd.f32 %v2958_v24, %v1812_v7 }
 0x3ad   : > { %v2252_v60 = vpop.f32.mrf.mxu1 }
 0x3ae   : > { %1865 = vst [vmem:[%s2965_s16 + $0xc8] sm:$0xff] %v1813_v8  ;;  %v1834_v9 = vadd.f32 %v2252_v60, %v2958_v24 }
 0x3af   : > { %v1825_v10 = vpop.f32.mrf.mxu1 }
 0x3b0   : > { %1870 = vst [vmem:[%s2965_s16 + $0xf0] sm:$0xff] %v1834_v9  ;;  %v1826_v11 = vadd.f32 %v2958_v24, %v1825_v10 }
 0x3b1   : > { %v2253_v12 = vpop.f32.mrf.mxu1 }
 0x3b2   : > { %1868 = vst [vmem:[%s2965_s16 + $0xe0] sm:$0xff] %v1826_v11  ;;  %v1837_v13 = vadd.f32 %v2253_v12, %v2958_v24 }
 0x3b3   : > { %v1828_v14 = vpop.f32.mrf.mxu1 }
 0x3b4   : > { %1871 = vst [vmem:[%s2965_s16 + $0xf8] sm:$0xff] %v1837_v13  ;;  %v1829_v1 = vadd.f32 %v2958_v24, %v1828_v14 }
 0x3b6   : > { %1869 = vst [vmem:[%s2965_s16 + $0xe8] sm:$0xff] %v1829_v1 }
 0x3b7 PF: > { %s22_s21 = sadd.s32 1, %s2501_s21  }
 0x3b8   : > { %p19_p4 = scmp.ge.s32.totalorder %s22_s21, 4  }
 0x3ba   :  { %21 = sbr.rel (!%p19_p4) target bundleno = 1 (0x1), region = 98 }

</bundles_post_ra>
